<compile_context>
chip_gen: v6e
topology: v6e:2x2x1
jax: 0.10.0
libtpu: 0.0.40
codegen_flags: <defaults>
</compile_context>

<pallas_src>
import functools

import jax
import jax.numpy as jnp
from jax.experimental import pallas as pl
from jax.experimental.pallas import tpu as pltpu


def _round_up(x, m):
    return ((x + m - 1) // m) * m


_GATE_ORDER = (0, 1, 3, 2)   # [i, f, g, o] -> [i, f, o, g]


def _prep_gate_cols(w, h, hp):
    """(K, 4*h) -> (K, 4*hp): reorder gate blocks to [i,f,o,g], pad each to hp cols."""
    k = w.shape[0]
    w4 = w.reshape(k, 4, h)[:, _GATE_ORDER, :]
    out = jnp.zeros((k, 4, hp), w.dtype).at[:, :, :h].set(w4)
    return out.reshape(k, 4 * hp)


def _pad_axis(a, axis, size):
    pad = [(0, 0)] * a.ndim
    pad[axis] = (0, size - a.shape[axis])
    return jnp.pad(a, pad)


# --------------------------- per-layer Pallas kernel ---------------------------
def _lstm_layer_kernel(x_ref, wih_ref, whh_ref, b_ref, h0_ref, c0_ref, len_ref,
                       out_ref, hn_ref, cn_ref, g_scr, *, t_blk, b_blk, hidden):
    """One grid step = t_blk timesteps of the LSTM cell for one batch block.

    x_ref   : (t_blk, b_blk, Dp) bf16   input block (layer input)
    wih_ref : (Dp, 4Hp) bf16, whh_ref : (Hp, 4Hp) bf16   resident weights
    b_ref   : (1, 4Hp) f32              resident bias (b_ih + b_hh pre-summed)
    len_ref : (b_blk, 1) int32          resident sequence lengths
    out_ref : (t_blk, b_blk, Hp) bf16   per-step hidden output
    hn_ref, cn_ref : (b_blk, Hp) f32    final state; also the (h, c) carry across
                                        time grid steps (no separate scratch).
    g_scr   : (t_blk*b_blk, 4Hp) f32    VMEM scratch for the fused input projection
    """
    hp = hidden
    t_id = pl.program_id(1)

    @pl.when(t_id == 0)
    def _():
        hn_ref[...] = h0_ref[...]
        cn_ref[...] = c0_ref[...]

    # Fused input projection for the whole time block: one big-M MXU matmul
    # (bf16 operands, f32 accumulation).  G never touches HBM.
    d_in = x_ref.shape[-1]
    xb = x_ref[...].reshape(t_blk * b_blk, d_in)
    g_scr[...] = (jnp.dot(xb, wih_ref[...], preferred_element_type=jnp.float32)
                  + b_ref[...])

    t_base = t_id * t_blk
    lengths = len_ref[...]                                    # (b_blk, 1) int32

    def step(i, carry):
        h, c = carry                                          # (b_blk, Hp) f32
        row = pl.multiple_of(i * b_blk, b_blk)
        g = g_scr[pl.ds(row, b_blk), :]                       # (b_blk, 4Hp) f32
        # W_hh is resident in VMEM; Mosaic keeps the RHS staged across the
        # short unrolled loop (per-step LHS is only b_blk rows).
        gates = g + jnp.dot(h.astype(jnp.bfloat16), whh_ref[...],
                            preferred_element_type=jnp.float32)

        # Gate columns are pre-permuted to [i, f, o, g]:
        # one sigmoid over a contiguous (b_blk, 3Hp) slab, one tanh over (b_blk, Hp).
        sig = jax.nn.sigmoid(gates[:, :3 * hp])
        i_g = sig[:, 0 * hp:1 * hp]
        f_g = sig[:, 1 * hp:2 * hp]
        o_g = sig[:, 2 * hp:3 * hp]
        g_g = jnp.tanh(gates[:, 3 * hp:4 * hp])

        c_next = f_g * c + i_g * g_g
        h_next = o_g * jnp.tanh(c_next)

        valid = (t_base + i) < lengths                        # (b_blk, 1) bool
        h_new = jnp.where(valid, h_next, h)
        c_new = jnp.where(valid, c_next, c)

        out_ref[i] = h_new.astype(out_ref.dtype)
        return (h_new, c_new)

    h, c = jax.lax.fori_loop(0, t_blk, step, (hn_ref[...], cn_ref[...]),
                             unroll=min(4, t_blk))
    hn_ref[...] = h
    cn_ref[...] = c


def _lstm_layer_pallas(x_bf16, length, h0, c0, w_ih_bf16, w_hh_bf16, bias_f32,
                       *, t_blk, b_blk):
    """Run one LSTM layer (input projection fused with the time recurrence)."""
    tp, bp, dp = x_bf16.shape
    hp = w_hh_bf16.shape[0]
    assert tp % t_blk == 0 and bp % b_blk == 0

    kernel = functools.partial(_lstm_layer_kernel, t_blk=t_blk, b_blk=b_blk,
                               hidden=hp)

    grid = (bp // b_blk, tp // t_blk)   # batch axis parallel, time sequential

    grid_spec = pltpu.PrefetchScalarGridSpec(
        num_scalar_prefetch=0,
        grid=grid,
        in_specs=[
            pl.BlockSpec((t_blk, b_blk, dp), lambda b, t: (t, b, 0)),   # x (bf16)
            pl.BlockSpec((dp, 4 * hp), lambda b, t: (0, 0)),            # W_ih (bf16)
            pl.BlockSpec((hp, 4 * hp), lambda b, t: (0, 0)),            # W_hh (bf16)
            pl.BlockSpec((1, 4 * hp), lambda b, t: (0, 0)),             # bias (f32)
            pl.BlockSpec((b_blk, hp), lambda b, t: (b, 0)),             # h0
            pl.BlockSpec((b_blk, hp), lambda b, t: (b, 0)),             # c0
            pl.BlockSpec((b_blk, 1), lambda b, t: (b, 0)),              # lengths
        ],
        out_specs=(
            pl.BlockSpec((t_blk, b_blk, hp), lambda b, t: (t, b, 0)),   # out (bf16)
            pl.BlockSpec((b_blk, hp), lambda b, t: (b, 0)),             # h_n (carry)
            pl.BlockSpec((b_blk, hp), lambda b, t: (b, 0)),             # c_n (carry)
        ),
        scratch_shapes=[pltpu.VMEM((t_blk * b_blk, 4 * hp), jnp.float32)],
    )

    # VMEM budget: 2x pipelined x/out blocks + resident weights/state/carry +
    # fused-gates scratch + slack.  Cap at 48 MiB (headroom on v7x's 64 MiB).
    blk_x = t_blk * b_blk * dp * 2
    blk_o = t_blk * b_blk * hp * 2
    resident = (dp * 4 * hp * 2) + (hp * 4 * hp * 2) + (4 * hp * 4) \
               + 4 * (b_blk * hp * 4) + (b_blk * 4)
    scratch = t_blk * b_blk * 4 * hp * 4
    vmem_limit = int(min(max(2 * (blk_x + blk_o) + 2 * resident + scratch
                             + (4 << 20), 16 << 20), 48 << 20))

    out, h_n, c_n = pl.pallas_call(
        kernel,
        grid_spec=grid_spec,
        out_shape=(
            jax.ShapeDtypeStruct((tp, bp, hp), jnp.bfloat16),
            jax.ShapeDtypeStruct((bp, hp), jnp.float32),
            jax.ShapeDtypeStruct((bp, hp), jnp.float32),
        ),
        compiler_params=pltpu.CompilerParams(
            dimension_semantics=("parallel", "arbitrary"),
            vmem_limit_bytes=vmem_limit,
        ),
    )(x_bf16, w_ih_bf16, w_hh_bf16, bias_f32, h0, c0, length)
    return out, h_n, c_n


# ------------------------------ multi-layer wrapper ------------------------------
def lstm_forward(x, hx, length, params, *, dropout=0.0, t_blk=8, b_blk=None):
    """Multi-layer LSTM forward (batch_first=False semantics).

    x      : (T, B, input_size) f32
    hx     : (h0, c0), each (num_layers, B, H); or None
    length : (B,) int32 or None
    params : list of (w_ih (Din,4H), w_hh (H,4H), b (1,4H)) per layer
             (gate order i, f, g, o; bias = b_ih + b_hh pre-summed)
    """
    t_len, b_sz, d0 = x.shape
    num_layers = len(params)
    h_sz = params[0][1].shape[0]

    if length is None:
        length = jnp.full((b_sz,), t_len, dtype=jnp.int32)
    if hx is None:
        zeros = jnp.zeros((num_layers, b_sz, h_sz), jnp.float32)
        hx = (zeros, zeros)
    h0_all, c0_all = hx

    bp = _round_up(b_sz, 16)           # bf16 sublane packing
    hp = _round_up(h_sz, 128)          # lane alignment (gate slices stay aligned)
    tp = _round_up(t_len, t_blk)
    if b_blk is None:
        b_blk = bp
    assert bp % b_blk == 0 and b_blk % 16 == 0

    len_p = jnp.pad(length.astype(jnp.int32), (0, bp - b_sz)).reshape(bp, 1)

    # Layer-0 input: pad time/batch/features, cast to bf16 once.
    dp0 = _round_up(d0, 128)
    x_p = jnp.pad(x, ((0, tp - t_len), (0, bp - b_sz), (0, dp0 - d0)))
    layer_in = x_p.astype(jnp.bfloat16)            # (Tp, Bp, Dp) bf16

    h_n, c_n = [], []
    for layer in range(num_layers):
        w_ih, w_hh, b = params[layer]
        dp = layer_in.shape[-1]

        w_ih_p = _pad_axis(_prep_gate_cols(w_ih, h_sz, hp), 0, dp).astype(jnp.bfloat16)
        w_hh_p = _pad_axis(_prep_gate_cols(w_hh, h_sz, hp), 0, hp).astype(jnp.bfloat16)
        b_p = _prep_gate_cols(b, h_sz, hp).astype(jnp.float32)
        h0_p = jnp.pad(h0_all[layer], ((0, bp - b_sz), (0, hp - h_sz))).astype(jnp.float32)
        c0_p = jnp.pad(c0_all[layer], ((0, bp - b_sz), (0, hp - h_sz))).astype(jnp.float32)

        out_p, hn_p, cn_p = _lstm_layer_pallas(
            layer_in, len_p, h0_p, c0_p, w_ih_p, w_hh_p, b_p,
            t_blk=t_blk, b_blk=b_blk)

        # TODO(synk): inter-layer nn.Dropout not implemented (identity; correct for eval / dropout=0).
        layer_in = out_p                 # bf16, already padded -> next layer input
        h_n.append(hn_p[:b_sz, :h_sz])
        c_n.append(cn_p[:b_sz, :h_sz])

    output = layer_in[:t_len, :b_sz, :h_sz].astype(jnp.float32)
    return output, (jnp.stack(h_n, 0), jnp.stack(c_n, 0))


# ----------------------- pure-JAX reference (for checking) -----------------------
# Mirrors the kernel's precision choices (bf16 matmul operands, f32 accumulation,
# f32 gates/state carry, bf16 inter-layer activations) so the comparison validates
# the implementation logic.
def _lstm_ref(x, hx, length, params):
    t_len = x.shape[0]
    h0_all, c0_all = hx
    mask = (jnp.arange(t_len)[:, None] < length[None, :])[:, :, None]   # (T,B,1) bool

    def layer_fn(xl_bf16, h0, c0, w_ih, w_hh, b):
        w_ih_bf = w_ih.astype(jnp.bfloat16)
        w_hh_bf = w_hh.astype(jnp.bfloat16)

        def step(carry, inp):
            h, c = carry
            x_t, m = inp
            gates = (jnp.dot(x_t, w_ih_bf, preferred_element_type=jnp.float32) + b
                     + jnp.dot(h.astype(jnp.bfloat16), w_hh_bf,
                               preferred_element_type=jnp.float32))
            i, f, g, o = jnp.split(gates, 4, axis=-1)
            i, f, o = jax.nn.sigmoid(i), jax.nn.sigmoid(f), jax.nn.sigmoid(o)
            g = jnp.tanh(g)
            c_nx = f * c + i * g
            h_nx = o * jnp.tanh(c_nx)
            h_nx = jnp.where(m, h_nx, h)
            c_nx = jnp.where(m, c_nx, c)
            return (h_nx, c_nx), h_nx.astype(jnp.bfloat16)

        (h_f, c_f), out = jax.lax.scan(step, (h0, c0), (xl_bf16, mask))
        return out, h_f, c_f

    h_n, c_n = [], []
    cur = x.astype(jnp.bfloat16)
    for layer in range(len(params)):
        w_ih, w_hh, b = params[layer]
        cur, hf, cf = layer_fn(cur, h0_all[layer], c0_all[layer], w_ih, w_hh, b)
        h_n.append(hf)
        c_n.append(cf)
    return cur.astype(jnp.float32), (jnp.stack(h_n), jnp.stack(c_n))


if __name__ == "__main__":
    T, B, Din, H, num_layers = 8, 20, 16, 32, 2

    key = jax.random.PRNGKey(0)
    keys = jax.random.split(key, 4 + num_layers)

    x = jax.random.normal(keys[0], (T, B, Din), jnp.float32)
    h0 = jax.random.normal(keys[1], (num_layers, B, H), jnp.float32)
    c0 = jax.random.normal(keys[2], (num_layers, B, H), jnp.float32)
    length = jax.random.randint(keys[3], (B,), 1, T + 1).astype(jnp.int32)

    # PyTorch-LSTMCell-style init: uniform(-1/sqrt(H), 1/sqrt(H)).
    bound = 1.0 / jnp.sqrt(jnp.float32(H))
    params = []
    for layer in range(num_layers):
        din_l = Din if layer == 0 else H
        kw, ku, kb = jax.random.split(keys[4 + layer], 3)
        w_ih = jax.random.uniform(kw, (din_l, 4 * H), jnp.float32, -bound, bound)
        w_hh = jax.random.uniform(ku, (H, 4 * H), jnp.float32, -bound, bound)
        b = jax.random.uniform(kb, (1, 4 * H), jnp.float32, -bound, bound)
        params.append((w_ih, w_hh, b))

    # t_blk=4 -> time grid of 2 (exercises the cross-block (h, c) carry);
    # b_blk=16 with Bp=32 -> batch grid of 2 (exercises the parallel batch axis).
    out, (h_n, c_n) = lstm_forward(x, (h0, c0), length, params, t_blk=4, b_blk=16)
    jax.block_until_ready((out, h_n, c_n))

    out_r, (h_r, c_r) = _lstm_ref(x, (h0, c0), length, params)

    assert out.shape == (T, B, H)
    assert h_n.shape == (num_layers, B, H) and c_n.shape == (num_layers, B, H)
    assert bool(jnp.all(jnp.isfinite(out)))
    assert jnp.allclose(out, out_r, rtol=2e-2, atol=2e-2)
    assert jnp.allclose(h_n, h_r, rtol=2e-2, atol=2e-2)
    assert jnp.allclose(c_n, c_r, rtol=2e-2, atol=2e-2)

    print("KERNEL_OK")
</pallas_src>

<mosaic_0001>
module attributes {stable_mosaic.version = 11 : i64} {
  func.func @_lstm_layer_kernel(%arg0: i32, %arg1: i32, %arg2: memref<4x16x128xbf16, #tpu.memory_space<vmem>>, %arg3: memref<128x512xbf16, #tpu.memory_space<vmem>>, %arg4: memref<128x512xbf16, #tpu.memory_space<vmem>>, %arg5: memref<1x512xf32, #tpu.memory_space<vmem>>, %arg6: memref<16x128xf32, #tpu.memory_space<vmem>>, %arg7: memref<16x128xf32, #tpu.memory_space<vmem>>, %arg8: memref<16x1xi32, #tpu.memory_space<vmem>>, %arg9: memref<4x16x128xbf16, #tpu.memory_space<vmem>>, %arg10: memref<16x128xf32, #tpu.memory_space<vmem>>, %arg11: memref<16x128xf32, #tpu.memory_space<vmem>>, %arg12: memref<64x512xf32, #tpu.memory_space<vmem>>) attributes {dimension_semantics = [#tpu.dimension_semantics<parallel>, #tpu.dimension_semantics<arbitrary>], iteration_bounds = array<i64: 2, 2>, scalar_prefetch = 0 : i64, scratch_operands = 1 : i64, tpu.core_type = #tpu.core_type<tc>, window_params = [{transform_indices = @transform_0, window_bounds = array<i64: 4, 16, 128>}, {pipeline_mode = #tpu.pipeline_mode<synchronous>, transform_indices = @transform_1, window_bounds = array<i64: 128, 512>}, {pipeline_mode = #tpu.pipeline_mode<synchronous>, transform_indices = @transform_2, window_bounds = array<i64: 128, 512>}, {pipeline_mode = #tpu.pipeline_mode<synchronous>, transform_indices = @transform_3, window_bounds = array<i64: 1, 512>}, {transform_indices = @transform_4, window_bounds = array<i64: 16, 128>}, {transform_indices = @transform_5, window_bounds = array<i64: 16, 128>}, {transform_indices = @transform_6, window_bounds = array<i64: 16, 1>}, {transform_indices = @transform_7, window_bounds = array<i64: 4, 16, 128>}, {transform_indices = @transform_8, window_bounds = array<i64: 16, 128>}, {transform_indices = @transform_9, window_bounds = array<i64: 16, 128>}]} {
    %c0_i32 = arith.constant 0 : i32
    %0 = arith.cmpi eq, %arg1, %c0_i32 : i32
    %1 = arith.extui %0 : i1 to i32
    %c0_i32_0 = arith.constant 0 : i32
    %2 = arith.cmpi ne, %1, %c0_i32_0 : i32
    scf.if %2 {
      %c0_52 = arith.constant 0 : index
      %c0_53 = arith.constant 0 : index
      %169 = vector.load %arg6[%c0_52, %c0_53] : memref<16x128xf32, #tpu.memory_space<vmem>>, vector<16x128xf32>
      %c0_54 = arith.constant 0 : index
      %c0_55 = arith.constant 0 : index
      %170 = vector.load %arg10[%c0_54, %c0_55] : memref<16x128xf32, #tpu.memory_space<vmem>>, vector<16x128xf32>
      tpu.vector_store %arg10[%c0_54, %c0_55], %169 {strides = array<i32>} : memref<16x128xf32, #tpu.memory_space<vmem>>, vector<16x128xf32>,
      %c0_56 = arith.constant 0 : index
      %c0_57 = arith.constant 0 : index
      %171 = vector.load %arg7[%c0_56, %c0_57] : memref<16x128xf32, #tpu.memory_space<vmem>>, vector<16x128xf32>
      %c0_58 = arith.constant 0 : index
      %c0_59 = arith.constant 0 : index
      %172 = vector.load %arg11[%c0_58, %c0_59] : memref<16x128xf32, #tpu.memory_space<vmem>>, vector<16x128xf32>
      tpu.vector_store %arg11[%c0_58, %c0_59], %171 {strides = array<i32>} : memref<16x128xf32, #tpu.memory_space<vmem>>, vector<16x128xf32>,
    } else {
    }
    %c0 = arith.constant 0 : index
    %c0_1 = arith.constant 0 : index
    %c0_2 = arith.constant 0 : index
    %3 = vector.load %arg2[%c0, %c0_1, %c0_2] : memref<4x16x128xbf16, #tpu.memory_space<vmem>>, vector<4x16x128xbf16>
    %4 = vector.shape_cast %3 : vector<4x16x128xbf16> to vector<64x128xbf16>
    %c0_3 = arith.constant 0 : index
    %c0_4 = arith.constant 0 : index
    %5 = vector.load %arg3[%c0_3, %c0_4] : memref<128x512xbf16, #tpu.memory_space<vmem>>, vector<128x512xbf16>
    %cst = arith.constant dense<0.000000e+00> : vector<64x512xf32>
    %6 = tpu.matmul %4, %5, %cst {dimension_numbers = #tpu.dot_dimension_numbers<[1], [0], [0], [1], [0, 0, 1, 1], [], []>} : vector<64x128xbf16>, vector<128x512xbf16>, vector<64x512xf32> -> vector<64x512xf32>
    %c0_5 = arith.constant 0 : index
    %c0_6 = arith.constant 0 : index
    %7 = vector.load %arg5[%c0_5, %c0_6] : memref<1x512xf32, #tpu.memory_space<vmem>>, vector<1x512xf32>
    %8 = vector.broadcast %7 : vector<1x512xf32> to vector<64x512xf32>
    %9 = arith.addf %6, %8 : vector<64x512xf32>
    %c0_7 = arith.constant 0 : index
    %c0_8 = arith.constant 0 : index
    %10 = vector.load %arg12[%c0_7, %c0_8] : memref<64x512xf32, #tpu.memory_space<vmem>>, vector<64x512xf32>
    tpu.vector_store %arg12[%c0_7, %c0_8], %9 {strides = array<i32>} : memref<64x512xf32, #tpu.memory_space<vmem>>, vector<64x512xf32>,
    %c4_i32 = arith.constant 4 : i32
    %11 = arith.muli %arg1, %c4_i32 : i32
    %c0_9 = arith.constant 0 : index
    %c0_10 = arith.constant 0 : index
    %12 = vector.load %arg8[%c0_9, %c0_10] : memref<16x1xi32, #tpu.memory_space<vmem>>, vector<16x1xi32>
    %c0_11 = arith.constant 0 : index
    %c0_12 = arith.constant 0 : index
    %13 = vector.load %arg10[%c0_11, %c0_12] : memref<16x128xf32, #tpu.memory_space<vmem>>, vector<16x128xf32>
    %c0_13 = arith.constant 0 : index
    %c0_14 = arith.constant 0 : index
    %14 = vector.load %arg11[%c0_13, %c0_14] : memref<16x128xf32, #tpu.memory_space<vmem>>, vector<16x128xf32>
    %c0_i32_15 = arith.constant 0 : i32
    %c16_i32 = arith.constant 16 : i32
    %15 = arith.muli %c0_i32_15, %c16_i32 : i32
    %16 = tpu.assume_multiple %15, 16 : i32
    %17 = arith.index_cast %16 : i32 to index
    %c0_16 = arith.constant 0 : index
    %18 = vector.load %arg12[%17, %c0_16] : memref<64x512xf32, #tpu.memory_space<vmem>>, vector<16x512xf32>
    %19 = arith.truncf %13 : vector<16x128xf32> to vector<16x128xbf16>
    %c0_17 = arith.constant 0 : index
    %c0_18 = arith.constant 0 : index
    %20 = vector.load %arg4[%c0_17, %c0_18] : memref<128x512xbf16, #tpu.memory_space<vmem>>, vector<128x512xbf16>
    %cst_19 = arith.constant dense<0.000000e+00> : vector<16x512xf32>
    %21 = tpu.matmul %19, %20, %cst_19 {dimension_numbers = #tpu.dot_dimension_numbers<[1], [0], [0], [1], [0, 0, 1, 1], [], []>} : vector<16x128xbf16>, vector<128x512xbf16>, vector<16x512xf32> -> vector<16x512xf32>
    %22 = arith.addf %18, %21 : vector<16x512xf32>
    %23 = vector.extract_strided_slice %22 {offsets = [0, 0], sizes = [16, 384], strides = [1, 1]} : vector<16x512xf32> to vector<16x384xf32>
    %24 = arith.negf %23 : vector<16x384xf32>
    %25 = math.exp %24 : vector<16x384xf32>
    %cst_20 = arith.constant 1.000000e+00 : f32
    %26 = vector.broadcast %cst_20 : f32 to vector<16x384xf32>
    %27 = arith.addf %26, %25 : vector<16x384xf32>
    %28 = arith.divf %26, %27 : vector<16x384xf32>
    %29 = vector.extract_strided_slice %28 {offsets = [0, 0], sizes = [16, 128], strides = [1, 1]} : vector<16x384xf32> to vector<16x128xf32>
    %30 = vector.extract_strided_slice %28 {offsets = [0, 128], sizes = [16, 128], strides = [1, 1]} : vector<16x384xf32> to vector<16x128xf32>
    %31 = vector.extract_strided_slice %28 {offsets = [0, 256], sizes = [16, 128], strides = [1, 1]} : vector<16x384xf32> to vector<16x128xf32>
    %32 = vector.extract_strided_slice %22 {offsets = [0, 384], sizes = [16, 128], strides = [1, 1]} : vector<16x512xf32> to vector<16x128xf32>
    %33 = math.tanh %32 : vector<16x128xf32>
    %34 = arith.mulf %30, %14 : vector<16x128xf32>
    %35 = arith.mulf %29, %33 : vector<16x128xf32>
    %36 = arith.addf %34, %35 : vector<16x128xf32>
    %37 = math.tanh %36 : vector<16x128xf32>
    %38 = arith.mulf %31, %37 : vector<16x128xf32>
    %39 = arith.addi %11, %c0_i32_15 : i32
    %40 = vector.broadcast %39 : i32 to vector<16x1xi32>
    %41 = arith.cmpi slt, %40, %12 : vector<16x1xi32>
    %42 = vector.shape_cast %41 : vector<16x1xi1> to vector<16x1xi1>
    %43 = vector.broadcast %42 : vector<16x1xi1> to vector<16x128xi1>
    %44 = arith.select %43, %38, %13 : vector<16x128xi1>, vector<16x128xf32>
    %45 = vector.shape_cast %41 : vector<16x1xi1> to vector<16x1xi1>
    %46 = vector.broadcast %45 : vector<16x1xi1> to vector<16x128xi1>
    %47 = arith.select %46, %36, %14 : vector<16x128xi1>, vector<16x128xf32>
    %48 = arith.truncf %44 : vector<16x128xf32> to vector<16x128xbf16>
    %49 = arith.index_cast %c0_i32_15 : i32 to index
    %c0_21 = arith.constant 0 : index
    %c0_22 = arith.constant 0 : index
    %50 = vector.load %arg9[%49, %c0_21, %c0_22] : memref<4x16x128xbf16, #tpu.memory_space<vmem>>, vector<1x16x128xbf16>
    %51 = vector.shape_cast %50 : vector<1x16x128xbf16> to vector<16x128xbf16>
    %52 = vector.shape_cast %48 : vector<16x128xbf16> to vector<1x16x128xbf16>
    tpu.vector_store %arg9[%49, %c0_21, %c0_22], %52 {strides = array<i32>} : memref<4x16x128xbf16, #tpu.memory_space<vmem>>, vector<1x16x128xbf16>,
    %c1_i32 = arith.constant 1 : i32
    %c16_i32_23 = arith.constant 16 : i32
    %53 = arith.muli %c1_i32, %c16_i32_23 : i32
    %54 = tpu.assume_multiple %53, 16 : i32
    %55 = arith.index_cast %54 : i32 to index
    %c0_24 = arith.constant 0 : index
    %56 = vector.load %arg12[%55, %c0_24] : memref<64x512xf32, #tpu.memory_space<vmem>>, vector<16x512xf32>
    %57 = arith.truncf %44 : vector<16x128xf32> to vector<16x128xbf16>
    %c0_25 = arith.constant 0 : index
    %c0_26 = arith.constant 0 : index
    %58 = vector.load %arg4[%c0_25, %c0_26] : memref<128x512xbf16, #tpu.memory_space<vmem>>, vector<128x512xbf16>
    %cst_27 = arith.constant dense<0.000000e+00> : vector<16x512xf32>
    %59 = tpu.matmul %57, %58, %cst_27 {dimension_numbers = #tpu.dot_dimension_numbers<[1], [0], [0], [1], [0, 0, 1, 1], [], []>} : vector<16x128xbf16>, vector<128x512xbf16>, vector<16x512xf32> -> vector<16x512xf32>
    %60 = arith.addf %56, %59 : vector<16x512xf32>
    %61 = vector.extract_strided_slice %60 {offsets = [0, 0], sizes = [16, 384], strides = [1, 1]} : vector<16x512xf32> to vector<16x384xf32>
    %62 = arith.negf %61 : vector<16x384xf32>
    %63 = math.exp %62 : vector<16x384xf32>
    %cst_28 = arith.constant 1.000000e+00 : f32
    %64 = vector.broadcast %cst_28 : f32 to vector<16x384xf32>
    %65 = arith.addf %64, %63 : vector<16x384xf32>
    %66 = arith.divf %64, %65 : vector<16x384xf32>
    %67 = vector.extract_strided_slice %66 {offsets = [0, 0], sizes = [16, 128], strides = [1, 1]} : vector<16x384xf32> to vector<16x128xf32>
    %68 = vector.extract_strided_slice %66 {offsets = [0, 128], sizes = [16, 128], strides = [1, 1]} : vector<16x384xf32> to vector<16x128xf32>
    %69 = vector.extract_strided_slice %66 {offsets = [0, 256], sizes = [16, 128], strides = [1, 1]} : vector<16x384xf32> to vector<16x128xf32>
    %70 = vector.extract_strided_slice %60 {offsets = [0, 384], sizes = [16, 128], strides = [1, 1]} : vector<16x512xf32> to vector<16x128xf32>
    %71 = math.tanh %70 : vector<16x128xf32>
    %72 = arith.mulf %68, %47 : vector<16x128xf32>
    %73 = arith.mulf %67, %71 : vector<16x128xf32>
    %74 = arith.addf %72, %73 : vector<16x128xf32>
    %75 = math.tanh %74 : vector<16x128xf32>
    %76 = arith.mulf %69, %75 : vector<16x128xf32>
    %77 = arith.addi %11, %c1_i32 : i32
    %78 = vector.broadcast %77 : i32 to vector<16x1xi32>
    %79 = arith.cmpi slt, %78, %12 : vector<16x1xi32>
    %80 = vector.shape_cast %79 : vector<16x1xi1> to vector<16x1xi1>
    %81 = vector.broadcast %80 : vector<16x1xi1> to vector<16x128xi1>
    %82 = arith.select %81, %76, %44 : vector<16x128xi1>, vector<16x128xf32>
    %83 = vector.shape_cast %79 : vector<16x1xi1> to vector<16x1xi1>
    %84 = vector.broadcast %83 : vector<16x1xi1> to vector<16x128xi1>
    %85 = arith.select %84, %74, %47 : vector<16x128xi1>, vector<16x128xf32>
    %86 = arith.truncf %82 : vector<16x128xf32> to vector<16x128xbf16>
    %87 = arith.index_cast %c1_i32 : i32 to index
    %c0_29 = arith.constant 0 : index
    %c0_30 = arith.constant 0 : index
    %88 = vector.load %arg9[%87, %c0_29, %c0_30] : memref<4x16x128xbf16, #tpu.memory_space<vmem>>, vector<1x16x128xbf16>
    %89 = vector.shape_cast %88 : vector<1x16x128xbf16> to vector<16x128xbf16>
    %90 = vector.shape_cast %86 : vector<16x128xbf16> to vector<1x16x128xbf16>
    tpu.vector_store %arg9[%87, %c0_29, %c0_30], %90 {strides = array<i32>} : memref<4x16x128xbf16, #tpu.memory_space<vmem>>, vector<1x16x128xbf16>,
    %c2_i32 = arith.constant 2 : i32
    %c16_i32_31 = arith.constant 16 : i32
    %91 = arith.muli %c2_i32, %c16_i32_31 : i32
    %92 = tpu.assume_multiple %91, 16 : i32
    %93 = arith.index_cast %92 : i32 to index
    %c0_32 = arith.constant 0 : index
    %94 = vector.load %arg12[%93, %c0_32] : memref<64x512xf32, #tpu.memory_space<vmem>>, vector<16x512xf32>
    %95 = arith.truncf %82 : vector<16x128xf32> to vector<16x128xbf16>
    %c0_33 = arith.constant 0 : index
    %c0_34 = arith.constant 0 : index
    %96 = vector.load %arg4[%c0_33, %c0_34] : memref<128x512xbf16, #tpu.memory_space<vmem>>, vector<128x512xbf16>
    %cst_35 = arith.constant dense<0.000000e+00> : vector<16x512xf32>
    %97 = tpu.matmul %95, %96, %cst_35 {dimension_numbers = #tpu.dot_dimension_numbers<[1], [0], [0], [1], [0, 0, 1, 1], [], []>} : vector<16x128xbf16>, vector<128x512xbf16>, vector<16x512xf32> -> vector<16x512xf32>
    %98 = arith.addf %94, %97 : vector<16x512xf32>
    %99 = vector.extract_strided_slice %98 {offsets = [0, 0], sizes = [16, 384], strides = [1, 1]} : vector<16x512xf32> to vector<16x384xf32>
    %100 = arith.negf %99 : vector<16x384xf32>
    %101 = math.exp %100 : vector<16x384xf32>
    %cst_36 = arith.constant 1.000000e+00 : f32
    %102 = vector.broadcast %cst_36 : f32 to vector<16x384xf32>
    %103 = arith.addf %102, %101 : vector<16x384xf32>
    %104 = arith.divf %102, %103 : vector<16x384xf32>
    %105 = vector.extract_strided_slice %104 {offsets = [0, 0], sizes = [16, 128], strides = [1, 1]} : vector<16x384xf32> to vector<16x128xf32>
    %106 = vector.extract_strided_slice %104 {offsets = [0, 128], sizes = [16, 128], strides = [1, 1]} : vector<16x384xf32> to vector<16x128xf32>
    %107 = vector.extract_strided_slice %104 {offsets = [0, 256], sizes = [16, 128], strides = [1, 1]} : vector<16x384xf32> to vector<16x128xf32>
    %108 = vector.extract_strided_slice %98 {offsets = [0, 384], sizes = [16, 128], strides = [1, 1]} : vector<16x512xf32> to vector<16x128xf32>
    %109 = math.tanh %108 : vector<16x128xf32>
    %110 = arith.mulf %106, %85 : vector<16x128xf32>
    %111 = arith.mulf %105, %109 : vector<16x128xf32>
    %112 = arith.addf %110, %111 : vector<16x128xf32>
    %113 = math.tanh %112 : vector<16x128xf32>
    %114 = arith.mulf %107, %113 : vector<16x128xf32>
    %115 = arith.addi %11, %c2_i32 : i32
    %116 = vector.broadcast %115 : i32 to vector<16x1xi32>
    %117 = arith.cmpi slt, %116, %12 : vector<16x1xi32>
    %118 = vector.shape_cast %117 : vector<16x1xi1> to vector<16x1xi1>
    %119 = vector.broadcast %118 : vector<16x1xi1> to vector<16x128xi1>
    %120 = arith.select %119, %114, %82 : vector<16x128xi1>, vector<16x128xf32>
    %121 = vector.shape_cast %117 : vector<16x1xi1> to vector<16x1xi1>
    %122 = vector.broadcast %121 : vector<16x1xi1> to vector<16x128xi1>
    %123 = arith.select %122, %112, %85 : vector<16x128xi1>, vector<16x128xf32>
    %124 = arith.truncf %120 : vector<16x128xf32> to vector<16x128xbf16>
    %125 = arith.index_cast %c2_i32 : i32 to index
    %c0_37 = arith.constant 0 : index
    %c0_38 = arith.constant 0 : index
    %126 = vector.load %arg9[%125, %c0_37, %c0_38] : memref<4x16x128xbf16, #tpu.memory_space<vmem>>, vector<1x16x128xbf16>
    %127 = vector.shape_cast %126 : vector<1x16x128xbf16> to vector<16x128xbf16>
    %128 = vector.shape_cast %124 : vector<16x128xbf16> to vector<1x16x128xbf16>
    tpu.vector_store %arg9[%125, %c0_37, %c0_38], %128 {strides = array<i32>} : memref<4x16x128xbf16, #tpu.memory_space<vmem>>, vector<1x16x128xbf16>,
    %c3_i32 = arith.constant 3 : i32
    %c16_i32_39 = arith.constant 16 : i32
    %129 = arith.muli %c3_i32, %c16_i32_39 : i32
    %130 = tpu.assume_multiple %129, 16 : i32
    %131 = arith.index_cast %130 : i32 to index
    %c0_40 = arith.constant 0 : index
    %132 = vector.load %arg12[%131, %c0_40] : memref<64x512xf32, #tpu.memory_space<vmem>>, vector<16x512xf32>
    %133 = arith.truncf %120 : vector<16x128xf32> to vector<16x128xbf16>
    %c0_41 = arith.constant 0 : index
    %c0_42 = arith.constant 0 : index
    %134 = vector.load %arg4[%c0_41, %c0_42] : memref<128x512xbf16, #tpu.memory_space<vmem>>, vector<128x512xbf16>
    %cst_43 = arith.constant dense<0.000000e+00> : vector<16x512xf32>
    %135 = tpu.matmul %133, %134, %cst_43 {dimension_numbers = #tpu.dot_dimension_numbers<[1], [0], [0], [1], [0, 0, 1, 1], [], []>} : vector<16x128xbf16>, vector<128x512xbf16>, vector<16x512xf32> -> vector<16x512xf32>
    %136 = arith.addf %132, %135 : vector<16x512xf32>
    %137 = vector.extract_strided_slice %136 {offsets = [0, 0], sizes = [16, 384], strides = [1, 1]} : vector<16x512xf32> to vector<16x384xf32>
    %138 = arith.negf %137 : vector<16x384xf32>
    %139 = math.exp %138 : vector<16x384xf32>
    %cst_44 = arith.constant 1.000000e+00 : f32
    %140 = vector.broadcast %cst_44 : f32 to vector<16x384xf32>
    %141 = arith.addf %140, %139 : vector<16x384xf32>
    %142 = arith.divf %140, %141 : vector<16x384xf32>
    %143 = vector.extract_strided_slice %142 {offsets = [0, 0], sizes = [16, 128], strides = [1, 1]} : vector<16x384xf32> to vector<16x128xf32>
    %144 = vector.extract_strided_slice %142 {offsets = [0, 128], sizes = [16, 128], strides = [1, 1]} : vector<16x384xf32> to vector<16x128xf32>
    %145 = vector.extract_strided_slice %142 {offsets = [0, 256], sizes = [16, 128], strides = [1, 1]} : vector<16x384xf32> to vector<16x128xf32>
    %146 = vector.extract_strided_slice %136 {offsets = [0, 384], sizes = [16, 128], strides = [1, 1]} : vector<16x512xf32> to vector<16x128xf32>
    %147 = math.tanh %146 : vector<16x128xf32>
    %148 = arith.mulf %144, %123 : vector<16x128xf32>
    %149 = arith.mulf %143, %147 : vector<16x128xf32>
    %150 = arith.addf %148, %149 : vector<16x128xf32>
    %151 = math.tanh %150 : vector<16x128xf32>
    %152 = arith.mulf %145, %151 : vector<16x128xf32>
    %153 = arith.addi %11, %c3_i32 : i32
    %154 = vector.broadcast %153 : i32 to vector<16x1xi32>
    %155 = arith.cmpi slt, %154, %12 : vector<16x1xi32>
    %156 = vector.shape_cast %155 : vector<16x1xi1> to vector<16x1xi1>
    %157 = vector.broadcast %156 : vector<16x1xi1> to vector<16x128xi1>
    %158 = arith.select %157, %152, %120 : vector<16x128xi1>, vector<16x128xf32>
    %159 = vector.shape_cast %155 : vector<16x1xi1> to vector<16x1xi1>
    %160 = vector.broadcast %159 : vector<16x1xi1> to vector<16x128xi1>
    %161 = arith.select %160, %150, %123 : vector<16x128xi1>, vector<16x128xf32>
    %162 = arith.truncf %158 : vector<16x128xf32> to vector<16x128xbf16>
    %163 = arith.index_cast %c3_i32 : i32 to index
    %c0_45 = arith.constant 0 : index
    %c0_46 = arith.constant 0 : index
    %164 = vector.load %arg9[%163, %c0_45, %c0_46] : memref<4x16x128xbf16, #tpu.memory_space<vmem>>, vector<1x16x128xbf16>
    %165 = vector.shape_cast %164 : vector<1x16x128xbf16> to vector<16x128xbf16>
    %166 = vector.shape_cast %162 : vector<16x128xbf16> to vector<1x16x128xbf16>
    tpu.vector_store %arg9[%163, %c0_45, %c0_46], %166 {strides = array<i32>} : memref<4x16x128xbf16, #tpu.memory_space<vmem>>, vector<1x16x128xbf16>,
    %c4_i32_47 = arith.constant 4 : i32
    %c0_48 = arith.constant 0 : index
    %c0_49 = arith.constant 0 : index
    %167 = vector.load %arg10[%c0_48, %c0_49] : memref<16x128xf32, #tpu.memory_space<vmem>>, vector<16x128xf32>
    tpu.vector_store %arg10[%c0_48, %c0_49], %158 {strides = array<i32>} : memref<16x128xf32, #tpu.memory_space<vmem>>, vector<16x128xf32>,
    %c0_50 = arith.constant 0 : index
    %c0_51 = arith.constant 0 : index
    %168 = vector.load %arg11[%c0_50, %c0_51] : memref<16x128xf32, #tpu.memory_space<vmem>>, vector<16x128xf32>
    tpu.vector_store %arg11[%c0_50, %c0_51], %161 {strides = array<i32>} : memref<16x128xf32, #tpu.memory_space<vmem>>, vector<16x128xf32>,
    return
  }
  func.func @transform_0(%arg0: i32, %arg1: i32) -> (i32, i32, i32) {
    %c0_i32 = arith.constant 0 : i32
    %c0_i32_0 = arith.constant 0 : i32
    return %arg1, %arg0, %c0_i32 : i32, i32, i32
  }
  func.func @transform_1(%arg0: i32, %arg1: i32) -> (i32, i32) {
    %c0_i32 = arith.constant 0 : i32
    %c0_i32_0 = arith.constant 0 : i32
    %c0_i32_1 = arith.constant 0 : i32
    return %c0_i32, %c0_i32_0 : i32, i32
  }
  func.func @transform_2(%arg0: i32, %arg1: i32) -> (i32, i32) {
    %c0_i32 = arith.constant 0 : i32
    %c0_i32_0 = arith.constant 0 : i32
    %c0_i32_1 = arith.constant 0 : i32
    return %c0_i32, %c0_i32_0 : i32, i32
  }
  func.func @transform_3(%arg0: i32, %arg1: i32) -> (i32, i32) {
    %c0_i32 = arith.constant 0 : i32
    %c0_i32_0 = arith.constant 0 : i32
    %c0_i32_1 = arith.constant 0 : i32
    return %c0_i32, %c0_i32_0 : i32, i32
  }
  func.func @transform_4(%arg0: i32, %arg1: i32) -> (i32, i32) {
    %c0_i32 = arith.constant 0 : i32
    %c0_i32_0 = arith.constant 0 : i32
    return %arg0, %c0_i32 : i32, i32
  }
  func.func @transform_5(%arg0: i32, %arg1: i32) -> (i32, i32) {
    %c0_i32 = arith.constant 0 : i32
    %c0_i32_0 = arith.constant 0 : i32
    return %arg0, %c0_i32 : i32, i32
  }
  func.func @transform_6(%arg0: i32, %arg1: i32) -> (i32, i32) {
    %c0_i32 = arith.constant 0 : i32
    %c0_i32_0 = arith.constant 0 : i32
    return %arg0, %c0_i32 : i32, i32
  }
  func.func @transform_7(%arg0: i32, %arg1: i32) -> (i32, i32, i32) {
    %c0_i32 = arith.constant 0 : i32
    %c0_i32_0 = arith.constant 0 : i32
    return %arg1, %arg0, %c0_i32 : i32, i32, i32
  }
  func.func @transform_8(%arg0: i32, %arg1: i32) -> (i32, i32) {
    %c0_i32 = arith.constant 0 : i32
    %c0_i32_0 = arith.constant 0 : i32
    return %arg0, %c0_i32 : i32, i32
  }
  func.func @transform_9(%arg0: i32, %arg1: i32) -> (i32, i32) {
    %c0_i32 = arith.constant 0 : i32
    %c0_i32_0 = arith.constant 0 : i32
    return %arg0, %c0_i32 : i32, i32
  }
}

</mosaic_0001>

<bundles_post_ra>
// kernel: tpu_custom_call.1
= control target key start
LH: loop header
LB: loop body
LE: loop exit
PB: predicated region body
PF: predicated region fallthrough
CT: control target
= control target key end

     0   :  { %s4622_s0 = inlined_call_operand.hbm [shape: bf16[8,32,128], index: 0, kind: input, shape index: {}]   ;;  %s4623_s1 = inlined_call_operand.hbm [shape: bf16[128,512], index: 1, kind: input, shape index: {}]   ;;  %s4624_s2 = inlined_call_operand.hbm [shape: bf16[128,512], index: 2, kind: input, shape index: {}]   ;;  %s4625_s3 = inlined_call_operand.vmem [shape: f32[1,512], index: 3, kind: input, shape index: {}]   ;;  %s4626_s4 = inlined_call_operand.vmem [shape: f32[32,128], index: 4, kind: input, shape index: {}]   ;;  %s4627_s5 = inlined_call_operand.hbm [shape: f32[32,128], index: 5, kind: input, shape index: {}]   ;;  %s4628_s6 = inlined_call_operand.vmem [shape: s32[32,1], index: 6, kind: input, shape index: {}]   ;;  %s4629_s7 = inlined_call_operand.hbm [shape: bf16[8,32,128], index: 7, kind: output, shape index: {0}]   ;;  %s4630_s8 = inlined_call_operand.hbm [shape: f32[32,128], index: 8, kind: output, shape index: {1}]   ;;  %s4631_s9 = inlined_call_operand.hbm [shape: f32[32,128], index: 9, kind: output, shape index: {2}]  }
   0x1   :  { %4657 = sst [smem:[#allocation58_spill]] %s4623_s1 }
   0x2   :  { %4658 = sst [smem:[#allocation59_spill]] %s4624_s2 }
   0x3   :  { %4659 = sst [smem:[#allocation60_spill]] %s4625_s3 }
   0x4   :  { %4660 = sst [smem:[#allocation61_spill]] %s4628_s6 }
   0x5   :  { %4661 = sst [smem:[#allocation62_spill]] %s4629_s7 }
   0x6   :  { %4662 = sst [smem:[#allocation63_spill]] %s4630_s8 }
   0x7   :  { %4663 = sst [smem:[#allocation64_spill]] %s4631_s9 }
   0x8   :  { %15 = vsyncpa [#allocation4], 0 }
   0x9   :  { %17 = vsyncpa [#allocation4 + $0x1], 0 }
   0xa   :  { %18 = vsyncpa [#allocation7], 0 }
   0xb   :  { %19 = vsyncpa [#allocation10], 0 }
   0xc   :  { %21 = vsyncpa [#allocation10 + $0x1], 0 }
   0xd   :  { %22 = vsyncpa [#allocation5], 0 }
   0xe   :  { %24 = vsyncpa [#allocation5 + $0x1], 0 }
   0xf   :  { %25 = vsyncpa [#allocation13], 0 }
  0x10   :  { %27 = vsyncpa [#allocation13 + $0x1], 0  ;;  %s3813_s30 = smov 0   ;;  %s3815_s10 = smov 0  }
  0x11   :  { %s3817_s11 = smov 0   ;;  %s3819_s12 = smov 0  }
  0x12   :  { %s3821_s13 = smov 0   ;;  %s3823_s14 = smov 0  }
  0x13   :  { %s3825_s15 = smov 0   ;;  %s3827_s16 = smov 0  }
  0x14   :  { %s3829_s17 = smov 0   ;;  %s3831_s18 = smov 0  }
  0x15   :  { %s3833_s19 = smov 0  }
  0x16 LB: > { %4664 = sst [smem:[#allocation25_spill]] %s3708_s12  ;;  %s3869_s20 = sadd.s32 4294967295, %s3736_s19   ;;  %s3736_s19 = sphi %s3833_s19, %s33_s19   ;;  %s3732_s18 = sphi %s3831_s18, %s4769_s18   ;;  %s3728_s17 = sphi %s3829_s17, %s4761_s17   ;;  %s3724_s16 = sphi %s3827_s16, %s4768_s16   ;;  %s3720_s15 = sphi %s3825_s15, %s4760_s15   ;;  %s3716_s14 = sphi %s3823_s14, %s4759_s14   ;;  %s3712_s13 = sphi %s3821_s13, %s4767_s13   ;;  %s3708_s12 = sphi %s3819_s12, %s4766_s12   ;;  %s3704_s11 = sphi %s3817_s11, %s4765_s11   ;;  %s3700_s10 = sphi %s3815_s10, %s4764_s10   ;;  %s3696_s30 = sphi %s3813_s30, %s4763_s30  }
  0x17   : > { %4665 = sst [smem:[#allocation26_spill]] %s3716_s14  ;;  %s42_s22 = sadd.s32 1, %s3728_s17 }
  0x18   : > { %4666 = sst [smem:[#allocation27_spill]] %s3720_s15  ;;  %s45_s23 = sadd.s32 1, %s3732_s18 }
  0x19   : > { %4667 = sst [smem:[#allocation28_spill]] %s3728_s17  ;;  %p43_p0 = scmp.ge.s32.totalorder %s42_s22, 2 }
  0x1a   : > { %4668 = sst [smem:[#allocation29_spill]] %s3736_s19  ;;  %s54_s24 = sadd.s32 1, %s3716_s14 }
  0x1b   : > { %p61_p1 = scmp.ne.s32.totalorder %s3716_s14, %s3712_s13  ;;  %p62_p2 = scmp.eq.s32.totalorder %s3736_s19, 0 }
  0x1c   : > { %s4771_s22 = smov (%p43_p0, %s42_s22), 0  ;;  %s4773_s23 = smov (!%p43_p0, %s45_s23), %s3732_s18 }
  0x1d   : > { %4669 = sst [smem:[#allocation30_spill]] %s4771_s22  ;;  %s49_s25 = ssub.s32 %s3728_s17, %s4771_s22 }
  0x1e   : > { %p3888_p3 = por %p62_p2, %p61_p1  ;;  %p47_p4 = scmp.ge.s32.totalorder %s4773_s23, 2 }
  0x1f   : > { %p4635_p5 = scmp.ne.s32.totalorder %s3712_s13, %s3708_s12  ;;  %p4636_p6 = scmp.eq.s32.totalorder %s3869_s20, 0 }
  0x20   : > { %s169_s27 = sadd.s32 1, %s3704_s11  ;;  %s4775_s23 = smov (%p47_p4, %s4773_s23), 0 }
  0x21   : > { %4671 = sst [smem:[#allocation31_spill]] %s4775_s23  ;;  %p3903_p7 = por %p4636_p6, %p4635_p5 }
  0x22   : > { %p176_p8 = scmp.ne.s32.totalorder %s3704_s11, %s3700_s10  ;;  %s50_s29 = ssub.s32 %s3732_s18, %s4775_s23 }
  0x23   : > { %s4672_s28 = scalar_select %p3903_p7, 1, 0 }
  0x24   : > { %p182_p9 = scmp.ne.s32.totalorder %s3700_s10, %s3696_s30  ;;  %s51_s21 = sor.u32 %s50_s29, %s49_s25 }
  0x25   : > { %p167_p10 = scmp.eq.s32.totalorder %s50_s29, 0  ;;  %p52_p11 = scmp.eq.s32.totalorder %s51_s21, 0 }
  0x26   : > { %p3918_p12 = por %p176_p8, %p62_p2  ;;  %p3933_p13 = por %p182_p9, %p4636_p6 }
  0x27   : > { %s3923_s9 = scalar_select %p167_p10, %s3704_s11, %s169_s27  }
  0x28   : > { %s3926_s8 = scalar_select %p52_p11, %s3716_s14, %s54_s24  }
  0x29   : > { %4674 = sst [smem:[#allocation32_spill]] %s3923_s9  ;;  %p234_p0 = scmp.eq.s32.totalorder %s3869_s20, 3 }
  0x2a   : > { %4675 = sst [smem:[#allocation33_spill]] %s3926_s8  ;;  %s4677_s25 = sadd.s32 4294967294, %s3736_s19  }
  0x2b   : > { %s4676_s7 = scalar_select %p3933_p13, 1, 0 }
  0x2c   : > { %p240_p4 = scmp.eq.s32.totalorder %s4677_s25, 3  ;;  %p2780_p5 = scmp.ge.s32.totalorder %s3736_s19, 1 }
  0x2d   : > { %p3944_p2 = por %p234_p0, %p61_p1  ;;  %p3951_p10 = por %p234_p0, %p176_p8 }
  0x2e   : > { %p4682_p11 = scmp.ne.s32.totalorder %s3712_s13, %s3708_s12  ;;  %p3965_p13 = por %p240_p4, %p182_p9 }
  0x2f   : > { %s4678_s21 = scalar_select %p3944_p2, 1, 0 }
  0x30   : > { %s4680_s24 = scalar_select %p3951_p10, 1, 0 }
  0x31   : > { %4679 = sst [smem:[#allocation34_spill]] %s4678_s21  ;;  %p3958_p6 = por %p240_p4, %p4682_p11 }
  0x32   : > { %4681 = sst [smem:[#allocation35_spill]] %s4680_s24  ;;  %p299_p7 = scmp.lt.s32.totalorder %s3736_s19, 5 }
  0x33   : > { %s4683_s27 = scalar_select %p3958_p6, 1, 0 }
  0x34   : > { %s4685_s29 = scalar_select %p3965_p13, 1, 0 }
  0x35   : > { %4684 = sst [smem:[#allocation36_spill]] %s4683_s27  ;;  %p3970_p1 = pnand %p2780_p5, %p299_p7 }
  0x36   : > { %4686 = sst [smem:[#allocation37_spill]] %s4685_s29  ;;  %s3738_s23 = smov [#allocation6]  }
  0x37   : > { %s4687_s25 = scalar_select %p3970_p1, 1, 0 }
  0x38   : > { %s311_s8 = sshll.u32 %s3738_s23, 4  ;;  %p3090_p8 = pneg %p3970_p1  ;;  %s312_s8 = int_to_ptr.vmem [resolvable:$true] %s311_s8 }
  0x39   : > { %s3739_s9 = smov [#allocation8]   ;;  %p4688_p0 = scmp.eq.s32.totalorder %s3869_s20, 0 }
  0x3a   : > { %s324_s12 = sshll.u32 %s3739_s9, 4  ;;  %s3511_s29 = scalar_lea.vmem %s312_s8, 4096  ;;  %s325_s12 = int_to_ptr.vmem [resolvable:$true] %s324_s12 }
  0x3b   : > { %p3978_p11 = pnand %p3090_p8, %p4688_p0  ;;  %p3512_p7 = scmp.ne.s32.totalorder %s312_s8, %s3511_s29 }
  0x3c   : > { %p3519_p13 = scmp.lt.s32.totalorder %s312_s8, %s312_s8  ;;  %p3520_p6 = scmp.lt.s32.totalorder %s3511_s29, %s3511_s29 }
  0x3d   : > { %p3502_p5 = pneg %p3978_p11 }
  0x3e   : > { %p3521_p10 = por %p3520_p6, %p3519_p13 }
  0x3f   : > { %p3514_p9 = pnand %p3512_p7, %p3502_p5 }
  0x41   : > { %p3515_p4 = pneg %p3514_p9 }
  0x43   : > { %p3522_p2 = pnand %p3521_p10, %p3515_p4 }
  0x45   : > { %3525 = shalt.err (!%p3522_p2)
}
  0x46   : > { %s3740_s9 = smov 256   ;;  %s3741_s23 = smov 16  }
  0x47   : > { %s4690_s1 = sld [smem:[#allocation58_spill]]  ;;  %s3537_s21 = scalar_lea.vmem %s325_s12, 4096 }
  0x48   : > { %p3538_p8 = scmp.ne.s32.totalorder %s325_s12, %s3537_s21  ;;  %p3545_p9 = scmp.lt.s32.totalorder %s325_s12, %s325_s12 }
  0x49   : > { %p3546_p1 = scmp.lt.s32.totalorder %s3537_s21, %s3537_s21 }
  0x4a   : > { %p3540_p0 = pnand %p3538_p8, %p3502_p5 }
  0x4b   : > { %p3547_p6 = por %p3546_p1, %p3545_p9 }
  0x4c   : > { %p3541_p7 = pneg %p3540_p0 }
  0x4d   : > { %3093 = dma.hbm_to_vmem [thread:$0]  (!%p3978_p11), %s4690_s1, 4096, %s312_s8, [#allocation7], %s3740_s9, %s3740_s9, %s3741_s23  }
  0x4e   : > { %p3548_p13 = pnand %p3547_p6, %p3541_p7 }
  0x50   : > { %3551 = shalt.err (!%p3548_p13)
}
  0x51   : > { %s4691_s2 = sld [smem:[#allocation59_spill]]  ;;  %p2783_p2 = scmp.ge.s32.totalorder %s3736_s19, 4 }
  0x53   : > { %337 = sbr.rel (%p2783_p2) target bundleno = 118 (0x76), region = 28 }
  0x57   : > { %3096 = dma.hbm_to_vmem [thread:$0]  (!%p3978_p11), %s4691_s2, 4096, %s325_s12, [#allocation7], %s3740_s9, %s3740_s9, %s3741_s23  }
  0x58   : > { %s341_s8 = sand.u32 1, %s3716_s14   ;;  %s2786_s21 = sshll.u32 %s3732_s18, 1 }
  0x59   : > { %s2784_s24 = sshll.u32 %s341_s8, 5  ;;  %s3023_s27 = sshll.u32 %s3728_s17, 4 }
  0x5a   : > { %s352_s30 = sadd.s32 %s3023_s27, %s2786_s21  ;;  %s345_s1 = scalar_lea.vmem [#allocation3], %s2784_s24 }
  0x5b   : > { %s367_s3 = sshll.u32 %s345_s1, 4  ;;  %s2788_s12 = sshll.u32 %s352_s30, 6  ;;  %s368_s3 = int_to_ptr.vmem [resolvable:$true] %s367_s3 }
  0x5c   : > { %s3063_s9 = scalar_select %p3888_p3, [#allocation0], [#allocation19] }
  0x5d   : > { %s3742_s23 = smov 256   ;;  %s3743_s2 = smov 128  }
  0x5e   : > { %3064 = sst [smem:[#allocation16]] (%p3888_p3), %s3742_s23  ;;  %s3744_s14 = smov 2  }
  0x5f   : > { %s359_s29 = sld [smem:[%s3063_s9]]   ;;  %s3745_s21 = smov 64  }
  0x60   : > { %3065 = sst [smem:[#allocation16 + $0x1]] (%p3888_p3), %s3743_s2  ;;  %s354_s27 = scalar_lea.hbm %s4622_s0, %s2788_s12 }
  0x61   : > { %3066 = sst [smem:[#allocation16 + $0x2]] (%p3888_p3), %s3744_s14  ;;  %s3746_s30 = smov 4  }
  0x62   : > { %3067 = sst [smem:[#allocation16 + $0x3]] (%p3888_p3), %s3745_s21  ;;  %s342_s17 = scalar_lea.sflag [#allocation4], %s341_s8 }
  0x63   : > { %3068 = sst [smem:[#allocation16 + $0x4]] (%p3888_p3), %s3745_s21  ;;  %s3747_s2 = smov 131072  }
  0x64   : > { %3069 = sst [smem:[#allocation16 + $0x5]] (%p3888_p3), %s3746_s30  ;;  %s399_s14 = sand.u32 1, %s3704_s11  }
  0x65   : > { %s2789_s9 = sshll.u32 %s359_s29, 26  ;;  %s3024_s19 = sshll.u32 %s3732_s18, 8 }
  0x66   : > { %s2790_s23 = sadd.s32 134217728, %s2789_s9  ;;  %s2791_s15 = sshll.u32 %s399_s14, 4 }
  0x67   : > { %3070 = dma.general (%p3888_p3), %s354_s27, 512, %s368_s3, %s342_s17, %s3747_s2, [#allocation16], %s2790_s23, 0  }
  0x68   : > { %s409_s12 = scalar_lea.hbm %s4627_s5, %s3024_s19  ;;  %s403_s21 = scalar_lea.vmem [#allocation9], %s2791_s15 }
  0x69   : > { %s410_s24 = sshll.u32 %s403_s21, 4  ;;  %s400_s30 = scalar_lea.sflag [#allocation10], %s399_s14  ;;  %s411_s24 = int_to_ptr.vmem [resolvable:$true] %s410_s24 }
  0x6a   : > { %s3564_s29 = scalar_lea.vmem %s411_s24, 256  ;;  %s3748_s17 = smov [#allocation9]  }
  0x6b   : > { %p3565_p10 = scmp.ne.s32.totalorder %s411_s24, %s3564_s29  ;;  %s3568_s26 = sshll.u32 %s3748_s17, 4  ;;  %s3569_s26 = int_to_ptr.vmem [resolvable:$false] %s3568_s26 }
  0x6c   : > { %s3570_s8 = scalar_lea.vmem %s3569_s26, 512  ;;  %p3571_p3 = scmp.lt.s32.totalorder %s411_s24, %s3569_s26 }
  0x6d   : > { %p3566_p1 = pnand %p3565_p10, %p3918_p12  ;;  %p3572_p5 = scmp.lt.s32.totalorder %s3570_s8, %s3564_s29 }
  0x6f   : > { %p3567_p11 = pneg %p3566_p1  ;;  %p3573_p4 = por %p3572_p5, %p3571_p3 }
  0x71   : > { %p3574_p8 = pnand %p3573_p4, %p3567_p11 }
  0x73   : > { %3577 = shalt.err (!%p3574_p8)
}
  0x74   : > { %s3749_s6 = smov 128   ;;  %s3750_s15 = smov 8  }
  0x75   : > { %3071 = dma.hbm_to_vmem [thread:$0]  (%p3918_p12), %s409_s12, 256, %s411_s24, %s400_s30, %s3749_s6, %s3749_s6, %s3750_s15  }
  0x76 PF: > { %p4692_p0 = scmp.ne.s32.totalorder %s4687_s25, 0 }
  0x78   : > { %431 = sbr.rel (%p4692_p0) target bundleno = 1313 (0x521), region = 48 }
  0x7d   : > { %s4035_s19 = sand.u32 1, %s3712_s13   ;;  %p4693_p7 = scmp.ne.s32.totalorder %s4672_s28, 0 }
  0x7e   : > { %s2795_s3 = sshll.u32 %s4035_s19, 5  ;;  %s434_s27 = scalar_lea.sflag [#allocation4], %s4035_s19 }
  0x7f   : > { %s4039_s9 = scalar_lea.vmem [#allocation3], %s2795_s3 }
  0x80   : > { %3675 = dma.done.wait (%p4693_p7), %s434_s27, 512  }
  0x81   : > { %3677 = vsyncadd (%p4693_p7), %s434_s27, 4294966784  ;;  %p4694_p12 = scmp.eq.s32.totalorder %s3869_s20, 0 }
  0x83   : > { %3679 = dma.done.wait (%p4694_p12), [#allocation7], 8192   ;;  %p4695_p9 = pmov %p4694_p12 }
  0x84   : > { %s450_s22 = sand.u32 1, %s3700_s10   ;;  %p4696_p6 = scmp.ne.s32.totalorder %s4676_s7, 0 }
  0x85   : > { %3681 = vsyncadd (%p4695_p9), [#allocation7], 4294959104  ;;  %s2798_s25 = sshll.u32 %s450_s22, 4  ;;  %s451_s23 = scalar_lea.sflag [#allocation10], %s450_s22 }
  0x86   : > { %s454_s2 = scalar_lea.vmem [#allocation9], %s2798_s25 }
  0x87   : > { %3683 = dma.done.wait (%p4696_p6), %s451_s23, 256  }
  0x88   : > { %3685 = vsyncadd (%p4696_p6), %s451_s23, 4294967040  ;;  %s4055_s28 = sshll.u32 %s3724_s16, 1  ;;  %s4697_s17 = sld [smem:[#allocation61_spill]] }
  0x89   : > { %p517_p13 = scmp.lt.s32.totalorder %s4055_s28, 3  ;;  %s4067_s8 = scalar_lea.vmem [#allocation11], %s2795_s3 }
  0x8a   : > { %s4069_s7 = scalar_lea.vmem [#allocation12], %s2798_s25  ;;  %s4071_s6 = scalar_lea.vmem [#allocation14], %s2798_s25 }
  0x8b   : > { %s518_s14 = scalar_select %p517_p13, %s4055_s28, 3 }
  0x8c   : > { %s4698_s15 = sld [smem:[#allocation27_spill]] }
  0x8d   : > { %s2803_s1 = sshll.u32 %s518_s14, 3 }
  0x8e   : > { %s520_s24 = scalar_lea.vmem %s4626_s4, %s2803_s1  ;;  %s4065_s26 = scalar_lea.vmem %s4697_s17, %s2803_s1 }
  0x92   : > { %p2806_p2 = scmp.ne.s32.totalorder %s4698_s15, 0 }
  0x94   : > { %537 = sbr.rel (%p2806_p2) target bundleno = 156 (0x9c), region = 68 }
  0x99   : > { %v538_v0 = vld [vmem:[%s520_s24] sm:$0xff]  ;;  %v539_v1 = vld [vmem:[%s520_s24 + $0x8] sm:$0xff] }
  0x9a   : > { %v542_v2 = vld [vmem:[%s454_s2] sm:$0xff]  ;;  %540 = vst [vmem:[%s4069_s7] sm:$0xff] %v538_v0  ;;  %541 = vst [vmem:[%s4069_s7 + $0x8] sm:$0xff] %v539_v1  ;;  %v543_v3 = vld [vmem:[%s454_s2 + $0x8] sm:$0xff] }
  0x9b   : > { %544 = vst [vmem:[%s4071_s6] sm:$0xff] %v542_v2  ;;  %545 = vst [vmem:[%s4071_s6 + $0x8] sm:$0xff] %v543_v3 }
  0x9c PF: > { %v3224_v4 = vld [vmem:[#allocation6 + $0xe4] ss:$16 sps:$4 sm:$0xff]   ;;  %v3226_v5 = vld [vmem:[#allocation6 + $0xec] ss:$16 sps:$4 sm:$0xff]   ;;  %v4655_v6 = vmov 0   ;;  %s4699_s3 = sld [smem:[#allocation27_spill]] }
  0x9d   : > { %824 = vmatprep.mubr.bf16.mxu0 %v4655_v6  ;;  %897 = vmatprep.mubr.bf16.mxu1 %v4655_v6  ;;  %v3228_v7 = vld [vmem:[#allocation6 + $0xe0] ss:$16 sps:$4 sm:$0xff]   ;;  %v3229_v8 = vld [vmem:[#allocation6 + $0xe8] ss:$16 sps:$4 sm:$0xff]   ;;  %v3230_v9 = vld [vmem:[#allocation6 + $0xc4] ss:$16 sps:$4 sm:$0xff]  }
  0x9e   : > { %792 = vmatprep.subr.bf16.mxu0 %v3224_v4  ;;  %3222 = vset.pattern.permute.xlu0 %v4655_v6  ;;  %v3232_v10 = vld [vmem:[#allocation6 + $0xcc] ss:$16 sps:$4 sm:$0xff]   ;;  %v3234_v11 = vld [vmem:[#allocation6 + $0xc0] ss:$16 sps:$4 sm:$0xff]   ;;  %v3235_v12 = vld [vmem:[#allocation6 + $0xc8] ss:$16 sps:$4 sm:$0xff]  }
  0x9f   : > { %865 = vmatprep.subr.bf16.mxu1 %v3226_v5  ;;  %3223 = vset.pattern.permute.xlu1 %v4655_v6  ;;  %v3236_v13 = vld [vmem:[#allocation6 + $0xa4] ss:$16 sps:$4 sm:$0xff]   ;;  %v3238_v14 = vld [vmem:[#allocation6 + $0xac] ss:$16 sps:$4 sm:$0xff]   ;;  %v3240_v15 = vld [vmem:[#allocation6 + $0xa0] ss:$16 sps:$4 sm:$0xff]  }
  0xa0   : > { %793 = vmatpush1.bf16.msra.mxu0 %v3228_v7  ;;  %866 = vmatpush1.bf16.msra.mxu1 %v3229_v8  ;;  %v3241_v16 = vld [vmem:[#allocation6 + $0xa8] ss:$16 sps:$4 sm:$0xff]   ;;  %v3242_v17 = vld [vmem:[#allocation6 + $0x84] ss:$16 sps:$4 sm:$0xff]   ;;  %v3244_v18 = vld [vmem:[#allocation6 + $0x8c] ss:$16 sps:$4 sm:$0xff]  }
  0xa1   : > { %794 = vmatprep.subr.bf16.mxu0 %v3230_v9  ;;  %867 = vmatprep.subr.bf16.mxu1 %v3232_v10  ;;  %v3246_v19 = vld [vmem:[#allocation6 + $0x80] ss:$16 sps:$4 sm:$0xff]   ;;  %v3247_v20 = vld [vmem:[#allocation6 + $0x88] ss:$16 sps:$4 sm:$0xff]   ;;  %v3248_v21 = vld [vmem:[#allocation6 + $0x64] ss:$16 sps:$4 sm:$0xff]  }
  0xa2   : > { %v3250_v22 = vld [vmem:[#allocation6 + $0x6c] ss:$16 sps:$4 sm:$0xff]   ;;  %v3252_v23 = vld [vmem:[#allocation6 + $0x60] ss:$16 sps:$4 sm:$0xff]   ;;  %v3253_v24 = vld [vmem:[#allocation6 + $0x68] ss:$16 sps:$4 sm:$0xff]  }
  0xa3   : > { %v3254_v25 = vld [vmem:[#allocation6 + $0x44] ss:$16 sps:$4 sm:$0xff]   ;;  %v3256_v26 = vld [vmem:[#allocation6 + $0x4c] ss:$16 sps:$4 sm:$0xff]   ;;  %v3258_v27 = vld [vmem:[#allocation6 + $0x40] ss:$16 sps:$4 sm:$0xff]  }
  0xa4   : > { %795 = vmatpush1.bf16.msra.mxu0 %v3234_v11  ;;  %868 = vmatpush1.bf16.msra.mxu1 %v3235_v12  ;;  %v3259_v28 = vld [vmem:[#allocation6 + $0x48] ss:$16 sps:$4 sm:$0xff]   ;;  %v3260_v29 = vld [vmem:[#allocation6 + $0x24] ss:$16 sps:$4 sm:$0xff]   ;;  %v3262_v30 = vld [vmem:[#allocation6 + $0x2c] ss:$16 sps:$4 sm:$0xff]  }
  0xa5   : > { %796 = vmatprep.subr.bf16.mxu0 %v3236_v13  ;;  %869 = vmatprep.subr.bf16.mxu1 %v3238_v14  ;;  %v3264_v31 = vld [vmem:[#allocation6 + $0x20] ss:$16 sps:$4 sm:$0xff]   ;;  %v3265_v32 = vld [vmem:[#allocation6 + $0x28] ss:$16 sps:$4 sm:$0xff]   ;;  %v3266_v33 = vld [vmem:[#allocation6 + $0x4] ss:$16 sps:$4 sm:$0xff]  }
  0xa6   : > { %v3268_v34 = vld [vmem:[#allocation6 + $0xc] ss:$16 sps:$4 sm:$0xff]   ;;  %v3270_v35 = vld [vmem:[#allocation6] ss:$16 sps:$4 sm:$0xff]   ;;  %v3271_v36 = vld [vmem:[#allocation6 + $0x8] ss:$16 sps:$4 sm:$0xff]  }
  0xa7   : > { %v4082_v37 = vld [vmem:[#allocation8 + $0xe4] ss:$16 sps:$4 sm:$0xff]   ;;  %v4084_v38 = vld [vmem:[#allocation8 + $0xec] ss:$16 sps:$4 sm:$0xff]   ;;  %v4087_v40 = vld [vmem:[#allocation8 + $0xe0] ss:$16 sps:$4 sm:$0xff]  }
  0xa8   : > { %797 = vmatpush1.bf16.msra.mxu0 %v3240_v15  ;;  %870 = vmatpush1.bf16.msra.mxu1 %v3241_v16  ;;  %v3272_v39 = vld [vmem:[%s4039_s9] sm:$0xff]   ;;  %v4089_v41 = vld [vmem:[#allocation8 + $0xe8] ss:$16 sps:$4 sm:$0xff]   ;;  %v4095_v43 = vld [vmem:[#allocation8 + $0xcc] ss:$16 sps:$4 sm:$0xff]   ;;  %s4125_s27 = sshll.u32 %s4699_s3, 2 }
  0xa9   : > { %798 = vmatprep.subr.bf16.mxu0 %v3242_v17  ;;  %871 = vmatprep.subr.bf16.mxu1 %v3244_v18  ;;  %v4093_v42 = vld [vmem:[#allocation8 + $0xc4] ss:$16 sps:$4 sm:$0xff]   ;;  %v4097_v44 = vld [vmem:[#allocation8 + $0xc0] ss:$16 sps:$4 sm:$0xff]   ;;  %v4101_v45 = vld [vmem:[#allocation8 + $0xc8] ss:$16 sps:$4 sm:$0xff]   ;;  %v1323_v57 = vstv %s4125_s27 }
  0xaa   : > { %v4105_v46 = vld [vmem:[#allocation8 + $0xa4] ss:$16 sps:$4 sm:$0xff]   ;;  %v4107_v47 = vld [vmem:[#allocation8 + $0xac] ss:$16 sps:$4 sm:$0xff]   ;;  %v4112_v49 = vld [vmem:[#allocation8 + $0xa0] ss:$16 sps:$4 sm:$0xff]  }
  0xab   : > { %v3285_v48 = vld [vmem:[%s4039_s9 + $0x8] sm:$0xff]   ;;  %v4118_v51 = vld [vmem:[#allocation8 + $0x84] ss:$16 sps:$4 sm:$0xff]   ;;  %v4127_v53 = vld [vmem:[#allocation8 + $0x80] ss:$16 sps:$4 sm:$0xff]   ;;  %s2069_s22 = sadd.s32 2, %s4125_s27 }
  0xac   : > { %799 = vmatpush1.bf16.msra.mxu0 %v3246_v19  ;;  %872 = vmatpush1.bf16.msra.mxu1 %v3247_v20  ;;  %v4114_v50 = vld [vmem:[#allocation8 + $0xa8] ss:$16 sps:$4 sm:$0xff]   ;;  %v4122_v52 = vld [vmem:[#allocation8 + $0x8c] ss:$16 sps:$4 sm:$0xff]   ;;  %v4133_v55 = vld [vmem:[#allocation8 + $0x64] ss:$16 sps:$4 sm:$0xff]   ;;  %v4185_v11 = vstv %s2069_s22 }
  0xad   : > { %800 = vmatprep.subr.bf16.mxu0 %v3248_v21  ;;  %873 = vmatprep.subr.bf16.mxu1 %v3250_v22  ;;  %v4129_v54 = vld [vmem:[#allocation8 + $0x88] ss:$16 sps:$4 sm:$0xff]   ;;  %v4137_v56 = vld [vmem:[#allocation8 + $0x6c] ss:$16 sps:$4 sm:$0xff]   ;;  %v3298_v58 = vld [vmem:[%s4039_s9 + $0x10] sm:$0xff]   ;;  %s1695_s25 = sadd.s32 1, %s4125_s27 }
  0xae   : > { %v4143_v59 = vld [vmem:[#allocation8 + $0x60] ss:$16 sps:$4 sm:$0xff]   ;;  %v4145_v60 = vld [vmem:[#allocation8 + $0x68] ss:$16 sps:$4 sm:$0xff]   ;;  %v4147_v61 = vld [vmem:[#allocation8 + $0x44] ss:$16 sps:$4 sm:$0xff]   ;;  %v1696_v22 = vstv %s1695_s25 }
  0xaf   : > { %v4150_v62 = vld [vmem:[%s4065_s26] sm:$0xff]  ;;  %v4153_v63 = vld [vmem:[%s4065_s26 + $0x8] sm:$0xff]  ;;  %v3311_v8 = vld [vmem:[%s4039_s9 + $0x18] sm:$0xff]   ;;  %s2443_s9 = sadd.s32 3, %s4125_s27  ;;  %s4700_s14 = sld [smem:[#allocation60_spill]] }
  0xb0   : > { %801 = vmatpush1.bf16.msra.mxu0 %v3252_v23  ;;  %874 = vmatpush1.bf16.msra.mxu1 %v3253_v24  ;;  %v4157_v0 = vld [vmem:[#allocation8 + $0x4c] ss:$16 sps:$4 sm:$0xff]   ;;  %vm1324_vm0 = vcmp.lt.s32.totalorder %v1323_v57, %v4150_v62  ;;  %vm1325_vm1 = vcmp.lt.s32.totalorder %v1323_v57, %v4153_v63  ;;  %v4164_v2 = vld [vmem:[#allocation8 + $0x40] ss:$16 sps:$4 sm:$0xff]   ;;  %v4166_v3 = vld [vmem:[#allocation8 + $0x48] ss:$16 sps:$4 sm:$0xff]   ;;  %vm2071_vm2 = vcmp.lt.s32.totalorder %v4185_v11, %v4150_v62  ;;  %v4200_v15 = vstv %s2443_s9 }
  0xb1   : > { %802 = vmatprep.subr.bf16.mxu0 %v3254_v25  ;;  %875 = vmatprep.subr.bf16.mxu1 %v3256_v26  ;;  %v1326_v1 = vsel %vm1324_vm0, 1, %v4655_v6  ;;  %v4168_v4 = vld [vmem:[#allocation8 + $0x24] ss:$16 sps:$4 sm:$0xff]   ;;  %v4170_v5 = vld [vmem:[#allocation8 + $0x2c] ss:$16 sps:$4 sm:$0xff]   ;;  %v1327_v7 = vsel %vm1325_vm1, 1, %v4655_v6  ;;  %vm2445_vm3 = vcmp.lt.s32.totalorder %v4200_v15, %v4150_v62  ;;  %vm1697_vm4 = vcmp.lt.s32.totalorder %v1696_v22, %v4150_v62 }
  0xb2   : > { %1329 = vperm.xlu0 %3222, %v1326_v1   ;;  %v4181_v9 = vld [vmem:[#allocation8 + $0x20] ss:$16 sps:$4 sm:$0xff]   ;;  %v4183_v10 = vld [vmem:[#allocation8 + $0x28] ss:$16 sps:$4 sm:$0xff]   ;;  %v4187_v12 = vld [vmem:[#allocation8 + $0x4] ss:$16 sps:$4 sm:$0xff]   ;;  %vm1698_vm5 = vcmp.lt.s32.totalorder %v1696_v22, %v4153_v63  ;;  %vm2072_vm6 = vcmp.lt.s32.totalorder %v4185_v11, %v4153_v63  ;;  %vm2446_vm7 = vcmp.lt.s32.totalorder %v4200_v15, %v4153_v63 }
  0xb3   : > { %v4189_v13 = vld [vmem:[#allocation8 + $0xc] ss:$16 sps:$4 sm:$0xff]   ;;  %v4198_v14 = vld [vmem:[#allocation8] ss:$16 sps:$4 sm:$0xff]   ;;  %v4204_v16 = vld [vmem:[#allocation8 + $0x8] ss:$16 sps:$4 sm:$0xff]  }
  0xb4   : > { %803 = vmatpush1.bf16.msra.mxu0 %v3258_v27  ;;  %876 = vmatpush1.bf16.msra.mxu1 %v3259_v28  ;;  %v4207_v17 = vld [vmem:[%s4069_s7] sm:$0xff]  ;;  %v4210_v18 = vld [vmem:[%s4069_s7 + $0x8] sm:$0xff]  ;;  %v2073_v19 = vsel %vm2071_vm2, 1, %v4655_v6  ;;  %v2447_v21 = vsel %vm2445_vm3, 1, %v4655_v6  ;;  %v1699_v23 = vsel %vm1697_vm4, 1, %v4655_v6  ;;  %v1700_v24 = vsel %vm1698_vm5, 1, %v4655_v6 }
  0xb5   : > { %804 = vmatprep.subr.bf16.mxu0 %v3260_v29  ;;  %877 = vmatprep.subr.bf16.mxu1 %v3262_v30  ;;  %v988_v20 = vpack.c.bf16 %v4210_v18, %v4207_v17  ;;  %v2074_v25 = vsel %vm2072_vm6, 1, %v4655_v6  ;;  %v2448_v26 = vsel %vm2446_vm7, 1, %v4655_v6  ;;  %v588_v27 = vlaneseq  ;;  %s2481_s1 = sand.u32 1, %s3869_s20   ;;  %s2477_s12 = scalar_lea.sflag [#allocation5], %s4035_s19 }
  0xb6   : > { %1332 = vperm.xlu0 %3222, %v1327_v7   ;;  %1702 = vperm.xlu1 %3223, %v1699_v23   ;;  %s4496_s21 = scalar_lea.sflag [#allocation13], %s2481_s1 }
  0xb7   : > { %v589_v28 = vshrl.u32 %v588_v27, 7 }
  0xb8   : > { %805 = vmatpush1.bf16.msra.mxu0 %v3264_v31  ;;  %878 = vmatpush1.bf16.msra.mxu1 %v3265_v32 }
  0xb9   : > { %806 = vmatprep.subr.bf16.mxu0 %v3266_v33  ;;  %879 = vmatprep.subr.bf16.mxu1 %v3268_v34  ;;  %v590_v33 = vsub.s32 0, %v589_v28  ;;  %v598_v34 = vsub.s32 2, %v589_v28 }
  0xba   : > { %2076 = vperm.xlu0 %3222, %v2073_v19   ;;  %1705 = vperm.xlu1 %3223, %v1700_v24  }
  0xbc   : > { %807 = vmatpush1.bf16.msra.mxu0 %v3270_v35  ;;  %880 = vmatpush1.bf16.msra.mxu1 %v3271_v36  ;;  %v586_v35 = vld [vmem:[%s4700_s14] sm:$0xf] }
  0xbd   : > { %1181 = vmatprep.subr.bf16.mxu0 %v4082_v37  ;;  %1224 = vmatprep.subr.bf16.mxu1 %v4084_v38  ;;  %v4290_v62 = vrot.slane %v586_v35, %v598_v34 }
  0xbe   : > { %2450 = vperm.xlu0 %3222, %v2447_v21   ;;  %2079 = vperm.xlu1 %3223, %v2074_v25  }
  0xbf   : > { %825 = vmatmul.mubr.bf16.vlgmr.msra.gmra.mxu0 %v3272_v39  ;;  %898 = vmatmul.mubr.bf16.vlgmr.msra.gmra.mxu1 %v3272_v39  ;;  %v602_v39 = vsub.s32 3, %v589_v28 }
  0xc0   : > { %1182 = vmatpush1.bf16.msra.mxu0 %v4087_v40  ;;  %1225 = vmatpush1.bf16.msra.mxu1 %v4089_v41 }
  0xc1   : > { %1183 = vmatprep.subr.bf16.mxu0 %v4093_v42  ;;  %1226 = vmatprep.subr.bf16.mxu1 %v4095_v43 }
  0xc2   : > { %834 = vmatprep.mubr.bf16.mxu0 %v4655_v6  ;;  %907 = vmatprep.mubr.bf16.mxu1 %v4655_v6 }
  0xc3   : > { %2453 = vperm.xlu1 %3223, %v2448_v26  }
  0xc4   : > { %1184 = vmatpush1.bf16.msra.mxu0 %v4097_v44  ;;  %1227 = vmatpush1.bf16.msra.mxu1 %v4101_v45 }
  0xc5   : > { %1185 = vmatprep.subr.bf16.mxu0 %v4105_v46  ;;  %1228 = vmatprep.subr.bf16.mxu1 %v4107_v47 }
  0xc7   : > { %835 = vmatmul.mubr.bf16.gmra.mxu0 %v3285_v48  ;;  %908 = vmatmul.mubr.bf16.gmra.mxu1 %v3285_v48 }
  0xc8   : > { %1186 = vmatpush1.bf16.msra.mxu0 %v4112_v49  ;;  %1229 = vmatpush1.bf16.msra.mxu1 %v4114_v50 }
  0xc9   : > { %1187 = vmatprep.subr.bf16.mxu0 %v4118_v51  ;;  %1230 = vmatprep.subr.bf16.mxu1 %v4122_v52 }
  0xca   : > { %844 = vmatprep.mubr.bf16.mxu0 %v4655_v6  ;;  %917 = vmatprep.mubr.bf16.mxu1 %v4655_v6 }
  0xcc   : > { %1188 = vmatpush1.bf16.msra.mxu0 %v4127_v53  ;;  %1231 = vmatpush1.bf16.msra.mxu1 %v4129_v54 }
  0xcd   : > { %1189 = vmatprep.subr.bf16.mxu0 %v4133_v55  ;;  %1232 = vmatprep.subr.bf16.mxu1 %v4137_v56 }
  0xcf   : > { %845 = vmatmul.mubr.bf16.gmra.mxu0 %v3298_v58  ;;  %918 = vmatmul.mubr.bf16.gmra.mxu1 %v3298_v58  ;;  %v591_v58 = vrot.slane %v586_v35, %v590_v33 }
  0xd0   : > { %1190 = vmatpush1.bf16.msra.mxu0 %v4143_v59  ;;  %1233 = vmatpush1.bf16.msra.mxu1 %v4145_v60 }
  0xd1   : > { %1191 = vmatprep.subr.bf16.mxu0 %v4147_v61  ;;  %1234 = vmatprep.subr.bf16.mxu1 %v4157_v0 }
  0xd2   : > { %854 = vmatprep.mubr.bf16.mxu0 %v4655_v6  ;;  %927 = vmatprep.mubr.bf16.mxu1 %v4655_v6 }
  0xd4   : > { %1192 = vmatpush1.bf16.msra.mxu0 %v4164_v2  ;;  %1235 = vmatpush1.bf16.msra.mxu1 %v4166_v3 }
  0xd5   : > { %1193 = vmatprep.subr.bf16.mxu0 %v4168_v4  ;;  %1236 = vmatprep.subr.bf16.mxu1 %v4170_v5 }
  0xd7   : > { %855 = vmatmul.mubr.bf16.gmra.mxu0 %v3311_v8  ;;  %928 = vmatmul.mubr.bf16.gmra.mxu1 %v3311_v8  ;;  %v4292_v8 = vrot.slane %v586_v35, %v602_v39 }
  0xd8   : > { %1194 = vmatpush1.bf16.msra.mxu0 %v4181_v9  ;;  %1237 = vmatpush1.bf16.msra.mxu1 %v4183_v10 }
  0xd9   : > { %1195 = vmatprep.subr.bf16.mxu0 %v4187_v12  ;;  %1238 = vmatprep.subr.bf16.mxu1 %v4189_v13 }
  0xda   : > { %1213 = vmatprep.mubr.bf16.mxu0 %v4655_v6  ;;  %1256 = vmatprep.mubr.bf16.mxu1 %v4655_v6 }
  0xdc   : > { %1196 = vmatpush1.bf16.msra.mxu0 %v4198_v14  ;;  %1239 = vmatpush1.bf16.msra.mxu1 %v4204_v16 }
  0xdd   : > { %1553 = vmatprep.subr.bf16.mxu0 %v4082_v37  ;;  %1596 = vmatprep.subr.bf16.mxu1 %v4084_v38 }
  0xdf   : > { %1214 = vmatmul.mubr.bf16.vlgmr.msra.gmra.mxu0 %v988_v20  ;;  %1257 = vmatmul.mubr.bf16.vlgmr.msra.gmra.mxu1 %v988_v20 }
  0xe0   : > { %1554 = vmatpush1.bf16.msra.mxu0 %v4087_v40  ;;  %1597 = vmatpush1.bf16.msra.mxu1 %v4089_v41 }
  0xe1   : > { %1555 = vmatprep.subr.bf16.mxu0 %v4093_v42  ;;  %1598 = vmatprep.subr.bf16.mxu1 %v4095_v43 }
  0xe2   : > { %1585 = vmatprep.mubr.bf16.mxu0 %v4655_v6  ;;  %1628 = vmatprep.mubr.bf16.mxu1 %v4655_v6 }
  0xe4   : > { %1556 = vmatpush1.bf16.msra.mxu0 %v4097_v44  ;;  %1599 = vmatpush1.bf16.msra.mxu1 %v4101_v45 }
  0xe5   : > { %1557 = vmatprep.subr.bf16.mxu0 %v4105_v46  ;;  %1600 = vmatprep.subr.bf16.mxu1 %v4107_v47 }
  0xe8   : > { %1558 = vmatpush1.bf16.msra.mxu0 %v4112_v49  ;;  %1601 = vmatpush1.bf16.msra.mxu1 %v4114_v50 }
  0xe9   : > { %1559 = vmatprep.subr.bf16.mxu0 %v4118_v51  ;;  %1602 = vmatprep.subr.bf16.mxu1 %v4122_v52 }
  0xec   : > { %1560 = vmatpush1.bf16.msra.mxu0 %v4127_v53  ;;  %1603 = vmatpush1.bf16.msra.mxu1 %v4129_v54 }
  0xed   : > { %1561 = vmatprep.subr.bf16.mxu0 %v4133_v55  ;;  %1604 = vmatprep.subr.bf16.mxu1 %v4137_v56 }
  0xf0   : > { %1562 = vmatpush1.bf16.msra.mxu0 %v4143_v59  ;;  %1605 = vmatpush1.bf16.msra.mxu1 %v4145_v60 }
  0xf1   : > { %1563 = vmatprep.subr.bf16.mxu0 %v4147_v61  ;;  %1606 = vmatprep.subr.bf16.mxu1 %v4157_v0 }
  0xf4   : > { %1564 = vmatpush1.bf16.msra.mxu0 %v4164_v2  ;;  %1607 = vmatpush1.bf16.msra.mxu1 %v4166_v3 }
  0xf5   : > { %1565 = vmatprep.subr.bf16.mxu0 %v4168_v4  ;;  %1608 = vmatprep.subr.bf16.mxu1 %v4170_v5 }
  0xf8   : > { %1566 = vmatpush1.bf16.msra.mxu0 %v4181_v9  ;;  %1609 = vmatpush1.bf16.msra.mxu1 %v4183_v10 }
  0xf9   : > { %1567 = vmatprep.subr.bf16.mxu0 %v4187_v12  ;;  %1610 = vmatprep.subr.bf16.mxu1 %v4189_v13 }
  0xfc   : > { %1568 = vmatpush1.bf16.msra.mxu0 %v4198_v14  ;;  %1611 = vmatpush1.bf16.msra.mxu1 %v4204_v16 }
  0xfd   : > { %1927 = vmatprep.subr.bf16.mxu0 %v4082_v37  ;;  %1970 = vmatprep.subr.bf16.mxu1 %v4084_v38  ;;  %v594_v38 = vsub.s32 1, %v589_v28 }
  0xff   : > { %v595_v7 = vrot.slane %v586_v35, %v594_v38 }
 0x17f   : > { %v4271_v29 = vpop.f32.mrf.mxu0  ;;  %v4273_v30 = vpop.f32.mrf.mxu1 }
 0x181   : > { %v4275_v31 = vpop.f32.mrf.mxu0  ;;  %v4277_v32 = vpop.f32.mrf.mxu1 }
 0x183   : > { %v4282_v36 = vpop.f32.mrf.mxu0  ;;  %v4284_v37 = vpop.f32.mrf.mxu1 }
 0x185   : > { %v4286_v48 = vpop.f32.mrf.mxu0  ;;  %v4288_v57 = vpop.f32.mrf.mxu1 }
 0x187   : > { %v836_v63 = vpop.f32.mrf.mxu0  ;;  %v909_v1 = vpop.f32.mrf.mxu1 }
 0x188   : > { %v4294_v11 = vadd.f32 %v836_v63, %v591_v58  ;;  %v4297_v15 = vadd.f32 %v909_v1, %v4290_v62 }
 0x189   : > { %v838_v19 = vpop.f32.mrf.mxu0  ;;  %v911_v20 = vpop.f32.mrf.mxu1 }
 0x18a   : > { %4701 = vst [vmem:[#allocation38_spill] sm:$0xff] %v4297_v15  ;;  %v4299_v21 = vadd.f32 %v838_v19, %v595_v7  ;;  %v4302_v22 = vadd.f32 %v911_v20, %v4292_v8 }
 0x18b   : > { %v840_v23 = vpop.f32.mrf.mxu0  ;;  %v913_v24 = vpop.f32.mrf.mxu1 }
 0x18c   : > { %4702 = vst [vmem:[#allocation39_spill] sm:$0xff] %v4302_v22  ;;  %v4304_v25 = vadd.f32 %v840_v23, %v591_v58  ;;  %v4307_v26 = vadd.f32 %v913_v24, %v4290_v62 }
 0x18d   : > { %v842_v27 = vpop.f32.mrf.mxu0  ;;  %v915_v28 = vpop.f32.mrf.mxu1 }
 0x18e   : > { %4703 = vst [vmem:[#allocation40_spill] sm:$0xff] %v4307_v26  ;;  %v4309_v33 = vadd.f32 %v842_v27, %v595_v7  ;;  %v4312_v34 = vadd.f32 %v915_v28, %v4292_v8 }
 0x18f   : > { %v846_v35 = vpop.f32.mrf.mxu0  ;;  %v919_v38 = vpop.f32.mrf.mxu1 }
 0x190   : > { %4704 = vst [vmem:[#allocation41_spill] sm:$0xff] %v4312_v34  ;;  %v4314_v39 = vadd.f32 %v846_v35, %v591_v58  ;;  %v4317_v63 = vadd.f32 %v919_v38, %v4290_v62 }
 0x191   : > { %v848_v1 = vpop.f32.mrf.mxu0  ;;  %v921_v19 = vpop.f32.mrf.mxu1 }
 0x192   : > { %4705 = vst [vmem:[#allocation42_spill] sm:$0xff] %v4314_v39  ;;  %4706 = vst [vmem:[#allocation43_spill] sm:$0xff] %v4317_v63  ;;  %v4319_v20 = vadd.f32 %v848_v1, %v595_v7  ;;  %v4322_v23 = vadd.f32 %v921_v19, %v4292_v8 }
 0x193   : > { %v850_v24 = vpop.f32.mrf.mxu0  ;;  %v923_v27 = vpop.f32.mrf.mxu1 }
 0x194   : > { %4707 = vst [vmem:[#allocation44_spill] sm:$0xff] %v4319_v20  ;;  %4708 = vst [vmem:[#allocation45_spill] sm:$0xff] %v4322_v23  ;;  %v4324_v6 = vadd.f32 %v850_v24, %v591_v58  ;;  %v4327_v28 = vadd.f32 %v923_v27, %v4290_v62 }
 0x195   : > { %v852_v34 = vpop.f32.mrf.mxu0  ;;  %v925_v35 = vpop.f32.mrf.mxu1 }
 0x196   : > { %4709 = vst [vmem:[#allocation46_spill] sm:$0xff] %v4324_v6  ;;  %4710 = vst [vmem:[#allocation47_spill] sm:$0xff] %v4327_v28  ;;  %v4329_v39 = vadd.f32 %v852_v34, %v595_v7  ;;  %v4332_v38 = vadd.f32 %v925_v35, %v4292_v8 }
 0x197   : > { %v856_v63 = vpop.f32.mrf.mxu0  ;;  %v929_v1 = vpop.f32.mrf.mxu1 }
 0x198   : > { %4711 = vst [vmem:[#allocation48_spill] sm:$0xff] %v4329_v39  ;;  %4712 = vst [vmem:[#allocation49_spill] sm:$0xff] %v4332_v38  ;;  %v4334_v20 = vadd.f32 %v856_v63, %v591_v58  ;;  %v4337_v19 = vadd.f32 %v929_v1, %v4290_v62 }
 0x199   : > { %v858_v23 = vpop.f32.mrf.mxu0  ;;  %v931_v24 = vpop.f32.mrf.mxu1 }
 0x19a   : > { %4713 = vst [vmem:[#allocation50_spill] sm:$0xff] %v4334_v20  ;;  %4714 = vst [vmem:[#allocation51_spill] sm:$0xff] %v4337_v19  ;;  %v4339_v6 = vadd.f32 %v858_v23, %v595_v7  ;;  %v4342_v27 = vadd.f32 %v931_v24, %v4292_v8  ;;  %v827_v20 = vadd.f32 %v4271_v29, %v591_v58 }
 0x19b   : > { %v860_v28 = vpop.f32.mrf.mxu0  ;;  %v933_v34 = vpop.f32.mrf.mxu1  ;;  %v829_v24 = vadd.f32 %v4275_v31, %v595_v7 }
 0x19c   : > { %4715 = vst [vmem:[#allocation52_spill] sm:$0xff] %v4339_v6  ;;  %4716 = vst [vmem:[#allocation53_spill] sm:$0xff] %v4342_v27  ;;  %v4344_v39 = vadd.f32 %v860_v28, %v591_v58  ;;  %v4347_v35 = vadd.f32 %v933_v34, %v4290_v62  ;;  %v831_v28 = vadd.f32 %v4282_v36, %v591_v58 }
 0x19d   : > { %v862_v38 = vpop.f32.mrf.mxu0  ;;  %v935_v63 = vpop.f32.mrf.mxu1  ;;  %v902_v58 = vadd.f32 %v4277_v32, %v4292_v8 }
 0x19e   : > { %4717 = vst [vmem:[#allocation54_spill] sm:$0xff] %v4344_v39  ;;  %4718 = vst [vmem:[#allocation55_spill] sm:$0xff] %v4347_v35  ;;  %v4350_v1 = vadd.f32 %v862_v38, %v595_v7  ;;  %v4353_v19 = vadd.f32 %v935_v63, %v4292_v8  ;;  %v833_v35 = vadd.f32 %v4286_v48, %v595_v7 }
 0x19f   : > { %v1215_v23 = vpop.f32.mrf.mxu0  ;;  %v1258_v26 = vpop.f32.mrf.mxu1  ;;  %v904_v48 = vadd.f32 %v4284_v37, %v4290_v62 }
 0x1a0   : > { %4719 = vst [vmem:[#allocation56_spill] sm:$0xff] %v4350_v1  ;;  %4720 = vst [vmem:[#allocation57_spill] sm:$0xff] %v4353_v19  ;;  %v1267_v27 = vadd.f32 %v1215_v23, %v827_v20  ;;  %v900_v20 = vadd.f32 %v4273_v30, %v4290_v62 }
 0x1a1   : > { %v1217_v6 = vpop.f32.mrf.mxu0  ;;  %v1260_v15 = vpop.f32.mrf.mxu1 }
 0x1a2   : > { %v2876_v39 = vmul.f32 -1.442695, %v1267_v27  ;;  %v1268_v22 = vadd.f32 %v1217_v6, %v829_v24  ;;  %v1269_v36 = vadd.f32 %v1258_v26, %v900_v20  ;;  %v1270_v27 = vadd.f32 %v1260_v15, %v902_v58 }
 0x1a3   : > { %v1219_v34 = vpop.f32.mrf.mxu0  ;;  %v1262_v6 = vpop.f32.mrf.mxu1 }
 0x1a4   : > { %3372 = vpow2.f32 %v2876_v39  ;;  %v2877_v29 = vmul.f32 -1.442695, %v1268_v22  ;;  %v1271_v38 = vadd.f32 %v1219_v34, %v831_v28  ;;  %v2878_v7 = vmul.f32 -1.442695, %v1269_v36  ;;  %v1330_v34 = vpop.permute.xlu0 %1329 }
 0x1a5   : > { %v1221_v1 = vpop.f32.mrf.mxu0  ;;  %v1273_v22 = vadd.f32 %v1262_v6, %v904_v48  ;;  %vm1334_vm8 = vcmp.eq.s32.totalorder %v1330_v34, 1  ;;  %v976_v6 = vld [vmem:[%s4071_s6 + $0x8] sm:$0xff]  ;;  %v4721_v34 = vmov 0  }
 0x1a6   : > { %3374 = vpow2.f32 %v2877_v29  ;;  %v2879_v63 = vmul.f32 -1.442695, %v1271_v38  ;;  %v1272_v19 = vadd.f32 %v1221_v1, %v833_v35  ;;  %v1264_v1 = vpop.f32.mrf.mxu1 }
 0x1a7   : > { %v2881_v30 = vmul.f32 -1.442695, %v1273_v22 }
 0x1a8   : > { %3376 = vpow2.f32 %v2879_v63  ;;  %v2880_v31 = vmul.f32 -1.442695, %v1272_v19  ;;  %v906_v19 = vadd.f32 %v4288_v57, %v4292_v8  ;;  %v975_v8 = vld [vmem:[%s4071_s6] sm:$0xff]  ;;  %v1333_v22 = vpop.permute.xlu0 %1332 }
 0x1a9   : > { %vm1335_vm9 = vcmp.eq.s32.totalorder %v1333_v22, 1 }
 0x1aa   : > { %3378 = vpow2.f32 %v2880_v31  ;;  %v1274_v37 = vadd.f32 %v1264_v1, %v906_v19 }
 0x1ab   : > { %3380 = vpow2.f32 %v2878_v7 }
 0x1b1   : > { %v3373_v39 = vpop.eup %3372 }
 0x1b2   : > { %v1293_v35 = vadd.f32 1.0, %v3373_v39 }
 0x1b3   : > { %v3375_v23 = vpop.eup %3374 }
 0x1b4   : > { %3382 = vrcp.f32 %v1293_v35  ;;  %v1294_v26 = vadd.f32 1.0, %v3375_v23 }
 0x1b5   : > { %v3377_v24 = vpop.eup %3376  ;;  %3384 = vtanh.f32 %v1270_v27 }
 0x1b6   : > { %3386 = vrcp.f32 %v1294_v26  ;;  %v1296_v32 = vadd.f32 1.0, %v3377_v24 }
 0x1b7   : > { %v3379_v62 = vpop.eup %3378  ;;  %3388 = vpow2.f32 %v2881_v30 }
 0x1b8   : > { %3390 = vrcp.f32 %v1296_v32  ;;  %v1297_v15 = vadd.f32 1.0, %v3379_v62  ;;  %v3381_v28 = vpop.eup %3380 }
 0x1b9   : > { %3392 = vtanh.f32 %v1274_v37  ;;  %v1295_v58 = vadd.f32 1.0, %v3381_v28 }
 0x1ba   : > { %3394 = vrcp.f32 %v1297_v15 }
 0x1c1   : > { %v3383_v57 = vpop.eup %3382 }
 0x1c2   : > { %v3385_v29 = vpop.eup %3384 }
 0x1c3   : > { %v3387_v38 = vpop.eup %3386  ;;  %v1315_v20 = vmul.f32 %v3385_v29, %v3383_v57  ;;  %v1703_v29 = vpop.permute.xlu1 %1702 }
 0x1c4   : > { %v3389_v63 = vpop.eup %3388  ;;  %v1313_v31 = vmul.f32 %v3387_v38, %v975_v8  ;;  %vm1707_vm10 = vcmp.eq.s32.totalorder %v1703_v29, 1 }
 0x1c5   : > { %v3391_v36 = vpop.eup %3390  ;;  %v1298_v27 = vadd.f32 1.0, %v3389_v63 }
 0x1c6   : > { %v3393_v48 = vpop.eup %3392  ;;  %v1317_v7 = vadd.f32 %v1315_v20, %v1313_v31 }
 0x1c7   : > { %v3395_v39 = vpop.eup %3394  ;;  %v1316_v23 = vmul.f32 %v3393_v48, %v3391_v36  ;;  %v1706_v22 = vpop.permute.xlu1 %1705 }
 0x1c8   : > { %3396 = vtanh.f32 %v1317_v7  ;;  %v4369_v35 = vsel %vm1334_vm8, %v1317_v7, %v975_v8  ;;  %v1314_v1 = vmul.f32 %v3395_v39, %v976_v6  ;;  %vm1708_vm11 = vcmp.eq.s32.totalorder %v1706_v22, 1  ;;  %v4729_v22 = vld [vmem:[#allocation48_spill] sm:$0xff] }
 0x1c9   : > { %3398 = vrcp.f32 %v1295_v58 }
 0x1ca   : > { %v1318_v19 = vadd.f32 %v1316_v23, %v1314_v1  ;;  %3400 = vrcp.f32 %v1298_v27 }
 0x1cc   : > { %3402 = vtanh.f32 %v1318_v19  ;;  %v4371_v30 = vsel %vm1335_vm9, %v1318_v19, %v976_v6 }
 0x1d5   : > { %v3397_v26 = vpop.eup %3396 }
 0x1d6   : > { %v3399_v24 = vpop.eup %3398 }
 0x1d7   : > { %v3401_v37 = vpop.eup %3400  ;;  %v1321_v32 = vmul.f32 %v3399_v24, %v3397_v26 }
 0x1d9   : > { %v3403_v62 = vpop.eup %3402  ;;  %v4375_v28 = vsel %vm1334_vm8, %v1321_v32, %v4207_v17 }
 0x1da   : > { %v1322_v15 = vmul.f32 %v3403_v62, %v3401_v37 }
 0x1dc   : > { %v4378_v57 = vsel %vm1335_vm9, %v1322_v15, %v4210_v18 }
 0x1dd   : > { %v1340_v8 = vpack.c.bf16 %v4378_v57, %v4375_v28 }
 0x1df   : > { %3040 = vst [vmem:[%s4067_s8] sm:$0xff] %v1340_v8   ;;  %1586 = vmatmul.mubr.bf16.vlgmr.msra.gmra.mxu0 %v1340_v8  ;;  %1629 = vmatmul.mubr.bf16.vlgmr.msra.gmra.mxu1 %v1340_v8 }
 0x1e0   : > { %1928 = vmatpush1.bf16.msra.mxu0 %v4087_v40  ;;  %1971 = vmatpush1.bf16.msra.mxu1 %v4089_v41 }
 0x1e1   : > { %1929 = vmatprep.subr.bf16.mxu0 %v4093_v42  ;;  %1972 = vmatprep.subr.bf16.mxu1 %v4095_v43 }
 0x1e2   : > { %1959 = vmatprep.mubr.bf16.mxu0 %v4721_v34  ;;  %2002 = vmatprep.mubr.bf16.mxu1 %v4721_v34 }
 0x1e4   : > { %1930 = vmatpush1.bf16.msra.mxu0 %v4097_v44  ;;  %1973 = vmatpush1.bf16.msra.mxu1 %v4101_v45 }
 0x1e5   : > { %1931 = vmatprep.subr.bf16.mxu0 %v4105_v46  ;;  %1974 = vmatprep.subr.bf16.mxu1 %v4107_v47 }
 0x1e8   : > { %1932 = vmatpush1.bf16.msra.mxu0 %v4112_v49  ;;  %1975 = vmatpush1.bf16.msra.mxu1 %v4114_v50 }
 0x1e9   : > { %1933 = vmatprep.subr.bf16.mxu0 %v4118_v51  ;;  %1976 = vmatprep.subr.bf16.mxu1 %v4122_v52 }
 0x1ec   : > { %1934 = vmatpush1.bf16.msra.mxu0 %v4127_v53  ;;  %1977 = vmatpush1.bf16.msra.mxu1 %v4129_v54 }
 0x1ed   : > { %1935 = vmatprep.subr.bf16.mxu0 %v4133_v55  ;;  %1978 = vmatprep.subr.bf16.mxu1 %v4137_v56  ;;  %v4722_v55 = vld [vmem:[#allocation38_spill] sm:$0xff] }
 0x1f0   : > { %1936 = vmatpush1.bf16.msra.mxu0 %v4143_v59  ;;  %1979 = vmatpush1.bf16.msra.mxu1 %v4145_v60  ;;  %v4723_v60 = vld [vmem:[#allocation40_spill] sm:$0xff] }
 0x1f1   : > { %1937 = vmatprep.subr.bf16.mxu0 %v4147_v61  ;;  %1980 = vmatprep.subr.bf16.mxu1 %v4157_v0 }
 0x1f4   : > { %1938 = vmatpush1.bf16.msra.mxu0 %v4164_v2  ;;  %1981 = vmatpush1.bf16.msra.mxu1 %v4166_v3  ;;  %v4724_v2 = vld [vmem:[#allocation39_spill] sm:$0xff] }
 0x1f5   : > { %1939 = vmatprep.subr.bf16.mxu0 %v4168_v4  ;;  %1982 = vmatprep.subr.bf16.mxu1 %v4170_v5 }
 0x1f8   : > { %1940 = vmatpush1.bf16.msra.mxu0 %v4181_v9  ;;  %1983 = vmatpush1.bf16.msra.mxu1 %v4183_v10 }
 0x1f9   : > { %1941 = vmatprep.subr.bf16.mxu0 %v4187_v12  ;;  %1984 = vmatprep.subr.bf16.mxu1 %v4189_v13  ;;  %v4725_v13 = vld [vmem:[#allocation41_spill] sm:$0xff] }
 0x1fc   : > { %1942 = vmatpush1.bf16.msra.mxu0 %v4198_v14  ;;  %1985 = vmatpush1.bf16.msra.mxu1 %v4204_v16 }
 0x29f   : > { %v1587_v40 = vpop.f32.mrf.mxu0  ;;  %v1630_v44 = vpop.f32.mrf.mxu1 }
 0x2a0   : > { %v1639_v41 = vadd.f32 %v1587_v40, %v4294_v11  ;;  %v1641_v56 = vadd.f32 %v1630_v44, %v4722_v55  ;;  %v3324_v44 = vld [vmem:[#allocation8 + $0xe0] ss:$16 sps:$4 sm:$0xff]   ;;  %v3347_v55 = vld [vmem:[#allocation8 + $0x8c] ss:$16 sps:$4 sm:$0xff]  }
 0x2a1   : > { %v1589_v42 = vpop.f32.mrf.mxu0  ;;  %v1632_v51 = vpop.f32.mrf.mxu1 }
 0x2a2   : > { %v2916_v43 = vmul.f32 -1.442695, %v1639_v41  ;;  %v1640_v45 = vadd.f32 %v1589_v42, %v4299_v21  ;;  %v2918_v0 = vmul.f32 -1.442695, %v1641_v56  ;;  %v1642_v3 = vadd.f32 %v1632_v51, %v4724_v2  ;;  %v3336_v51 = vld [vmem:[#allocation8 + $0xa0] ss:$16 sps:$4 sm:$0xff]  }
 0x2a3   : > { %v1591_v46 = vpop.f32.mrf.mxu0  ;;  %v1634_v59 = vpop.f32.mrf.mxu1  ;;  %v3350_v56 = vld [vmem:[#allocation8 + $0x64] ss:$16 sps:$4 sm:$0xff]   ;;  %v3359_v2 = vld [vmem:[#allocation8 + $0x4c] ss:$16 sps:$4 sm:$0xff]  }
 0x2a4   : > { %3404 = vpow2.f32 %v2916_v43  ;;  %v2917_v47 = vmul.f32 -1.442695, %v1640_v45  ;;  %v1643_v49 = vadd.f32 %v1591_v46, %v4304_v25  ;;  %v1645_v61 = vadd.f32 %v1634_v59, %v4723_v60  ;;  %v3329_v43 = vld [vmem:[#allocation8 + $0xec] ss:$16 sps:$4 sm:$0xff]   ;;  %v3327_v45 = vld [vmem:[#allocation8 + $0xe8] ss:$16 sps:$4 sm:$0xff]  }
 0x2a5   : > { %v1593_v50 = vpop.f32.mrf.mxu0  ;;  %v1636_v4 = vpop.f32.mrf.mxu1  ;;  %2344 = vmatprep.subr.bf16.mxu1 %v3329_v43  ;;  %v3330_v46 = vld [vmem:[#allocation8 + $0xc0] ss:$16 sps:$4 sm:$0xff]   ;;  %v3353_v59 = vld [vmem:[#allocation8 + $0x6c] ss:$16 sps:$4 sm:$0xff]  }
 0x2a6   : > { %3406 = vpow2.f32 %v2917_v47  ;;  %v2919_v52 = vmul.f32 -1.442695, %v1643_v49  ;;  %v1644_v53 = vadd.f32 %v1593_v50, %v4309_v33  ;;  %v2921_v9 = vmul.f32 -1.442695, %v1645_v61  ;;  %v3333_v47 = vld [vmem:[#allocation8 + $0xc8] ss:$16 sps:$4 sm:$0xff]  }
 0x2a7   : > { %v1646_v14 = vadd.f32 %v1636_v4, %v4725_v13  ;;  %v3338_v49 = vld [vmem:[#allocation8 + $0xa4] ss:$16 sps:$4 sm:$0xff]   ;;  %v3341_v50 = vld [vmem:[#allocation8 + $0xac] ss:$16 sps:$4 sm:$0xff]   ;;  %v3348_v60 = vld [vmem:[#allocation8 + $0x60] ss:$16 sps:$4 sm:$0xff]  }
 0x2a8   : > { %3408 = vpow2.f32 %v2919_v52  ;;  %v2920_v54 = vmul.f32 -1.442695, %v1644_v53  ;;  %v3342_v52 = vld [vmem:[#allocation8 + $0x80] ss:$16 sps:$4 sm:$0xff]   ;;  %v3344_v53 = vld [vmem:[#allocation8 + $0x84] ss:$16 sps:$4 sm:$0xff]  }
 0x2a9   : > { %v3351_v61 = vld [vmem:[#allocation8 + $0x68] ss:$16 sps:$4 sm:$0xff]   ;;  %v3368_v13 = vld [vmem:[#allocation8 + $0x4] ss:$16 sps:$4 sm:$0xff]  }
 0x2aa   : > { %3410 = vpow2.f32 %v2920_v54  ;;  %v3345_v54 = vld [vmem:[#allocation8 + $0x88] ss:$16 sps:$4 sm:$0xff]  }
 0x2ab   : > { %3412 = vpow2.f32 %v2918_v0  ;;  %v3356_v0 = vld [vmem:[#allocation8 + $0x44] ss:$16 sps:$4 sm:$0xff]   ;;  %v3357_v4 = vld [vmem:[#allocation8 + $0x48] ss:$16 sps:$4 sm:$0xff]  }
 0x2ac   : > { %3414 = vtanh.f32 %v1642_v3  ;;  %v3354_v3 = vld [vmem:[#allocation8 + $0x40] ss:$16 sps:$4 sm:$0xff]  }
 0x2b1   : > { %v3405_v5 = vpop.eup %3404 }
 0x2b2   : > { %v1665_v10 = vadd.f32 1.0, %v3405_v5  ;;  %v3362_v5 = vld [vmem:[#allocation8 + $0x24] ss:$16 sps:$4 sm:$0xff]  }
 0x2b3   : > { %v3407_v12 = vpop.eup %3406 }
 0x2b4   : > { %3416 = vrcp.f32 %v1665_v10  ;;  %v1666_v16 = vadd.f32 1.0, %v3407_v12  ;;  %v3360_v10 = vld [vmem:[#allocation8 + $0x20] ss:$16 sps:$4 sm:$0xff]   ;;  %v3363_v12 = vld [vmem:[#allocation8 + $0x28] ss:$16 sps:$4 sm:$0xff]  }
 0x2b5   : > { %v3409_v17 = vpop.eup %3408  ;;  %3418 = vpow2.f32 %v2921_v9  ;;  %v3365_v9 = vld [vmem:[#allocation8 + $0x2c] ss:$16 sps:$4 sm:$0xff]  }
 0x2b6   : > { %3420 = vrcp.f32 %v1666_v16  ;;  %v1668_v18 = vadd.f32 1.0, %v3409_v17  ;;  %v3366_v16 = vld [vmem:[#allocation8] ss:$16 sps:$4 sm:$0xff]   ;;  %v3369_v17 = vld [vmem:[#allocation8 + $0x8] ss:$16 sps:$4 sm:$0xff]  }
 0x2b7   : > { %v3411_v11 = vpop.eup %3410  ;;  %3422 = vtanh.f32 %v1646_v14  ;;  %v3371_v14 = vld [vmem:[#allocation8 + $0xc] ss:$16 sps:$4 sm:$0xff]  }
 0x2b8   : > { %3424 = vrcp.f32 %v1668_v18  ;;  %v1669_v21 = vadd.f32 1.0, %v3411_v11  ;;  %v3413_v25 = vpop.eup %3412  ;;  %v4726_v11 = vld [vmem:[#allocation42_spill] sm:$0xff] }
 0x2b9   : > { %v3415_v33 = vpop.eup %3414  ;;  %v1667_v36 = vadd.f32 1.0, %v3413_v25 }
 0x2ba   : > { %3426 = vrcp.f32 %v1669_v21 }
 0x2bb   : > { %3428 = vrcp.f32 %v1667_v36  ;;  %v4728_v36 = vld [vmem:[#allocation46_spill] sm:$0xff] }
 0x2c1   : > { %v3417_v38 = vpop.eup %3416 }
 0x2c2   : > { %v3419_v63 = vpop.eup %3418  ;;  %v1687_v31 = vmul.f32 %v3417_v38, %v3415_v33  ;;  %v4727_v38 = vld [vmem:[#allocation44_spill] sm:$0xff] }
 0x2c3   : > { %v3421_v20 = vpop.eup %3420  ;;  %v1670_v1 = vadd.f32 1.0, %v3419_v63 }
 0x2c4   : > { %v3423_v6 = vpop.eup %3422  ;;  %v1685_v48 = vmul.f32 %v3421_v20, %v4369_v35 }
 0x2c5   : > { %v3425_v58 = vpop.eup %3424 }
 0x2c6   : > { %v1689_v7 = vadd.f32 %v1687_v31, %v1685_v48  ;;  %v1688_v39 = vmul.f32 %v3425_v58, %v3423_v6 }
 0x2c7   : > { %v3427_v27 = vpop.eup %3426 }
 0x2c8   : > { %3430 = vtanh.f32 %v1689_v7  ;;  %v4426_v23 = vsel %vm1707_vm10, %v1689_v7, %v4369_v35  ;;  %v1686_v19 = vmul.f32 %v3427_v27, %v4371_v30  ;;  %v3429_v37 = vpop.eup %3428 }
 0x2c9   : > { %3432 = vrcp.f32 %v1670_v1  ;;  %v4730_v1 = vld [vmem:[#allocation43_spill] sm:$0xff] }
 0x2ca   : > { %v1690_v26 = vadd.f32 %v1688_v39, %v1686_v19 }
 0x2cc   : > { %3434 = vtanh.f32 %v1690_v26  ;;  %v4430_v24 = vsel %vm1708_vm11, %v1690_v26, %v4371_v30  ;;  %v3326_v30 = vld [vmem:[#allocation8 + $0xe4] ss:$16 sps:$4 sm:$0xff]  }
 0x2cd   : > { %2301 = vmatprep.subr.bf16.mxu0 %v3326_v30 }
 0x2d5   : > { %v3431_v32 = vpop.eup %3430 }
 0x2d6   : > { %v1693_v62 = vmul.f32 %v3431_v32, %v3429_v37  ;;  %v3433_v15 = vpop.eup %3432  ;;  %v4731_v37 = vld [vmem:[#allocation47_spill] sm:$0xff] }
 0x2d8   : > { %v4434_v35 = vsel %vm1707_vm10, %v1693_v62, %v4375_v28  ;;  %v3332_v28 = vld [vmem:[#allocation8 + $0xc4] ss:$16 sps:$4 sm:$0xff]  }
 0x2d9   : > { %v3435_v8 = vpop.eup %3434 }
 0x2da   : > { %v1694_v40 = vmul.f32 %v3435_v8, %v3433_v15  ;;  %v4732_v15 = vld [vmem:[#allocation45_spill] sm:$0xff] }
 0x2dc   : > { %v4437_v41 = vsel %vm1708_vm11, %v1694_v40, %v4378_v57  ;;  %v3335_v57 = vld [vmem:[#allocation8 + $0xcc] ss:$16 sps:$4 sm:$0xff]  }
 0x2dd   : > { %v1713_v42 = vpack.c.bf16 %v4437_v41, %v4434_v35 }
 0x2df   : > { %3056 = vst [vmem:[%s4067_s8 + $0x8] sm:$0xff] %v1713_v42   ;;  %1960 = vmatmul.mubr.bf16.vlgmr.msra.gmra.mxu0 %v1713_v42  ;;  %2003 = vmatmul.mubr.bf16.vlgmr.msra.gmra.mxu1 %v1713_v42 }
 0x2e0   : > { %2333 = vmatprep.mubr.bf16.mxu0 %v4721_v34  ;;  %2376 = vmatprep.mubr.bf16.mxu1 %v4721_v34  ;;  %v3339_v34 = vld [vmem:[#allocation8 + $0xa8] ss:$16 sps:$4 sm:$0xff]  }
 0x2e1   : > { %2302 = vmatpush1.bf16.msra.mxu0 %v3324_v44  ;;  %2345 = vmatpush1.bf16.msra.mxu1 %v3327_v45  ;;  %v4733_v45 = vld [vmem:[#allocation49_spill] sm:$0xff] }
 0x2e2   : > { %2303 = vmatprep.subr.bf16.mxu0 %v3332_v28  ;;  %2346 = vmatprep.subr.bf16.mxu1 %v3335_v57 }
 0x2e5   : > { %2304 = vmatpush1.bf16.msra.mxu0 %v3330_v46  ;;  %2347 = vmatpush1.bf16.msra.mxu1 %v3333_v47 }
 0x2e6   : > { %2305 = vmatprep.subr.bf16.mxu0 %v3338_v49  ;;  %2348 = vmatprep.subr.bf16.mxu1 %v3341_v50 }
 0x2e9   : > { %2306 = vmatpush1.bf16.msra.mxu0 %v3336_v51  ;;  %2349 = vmatpush1.bf16.msra.mxu1 %v3339_v34 }
 0x2ea   : > { %2307 = vmatprep.subr.bf16.mxu0 %v3344_v53  ;;  %2350 = vmatprep.subr.bf16.mxu1 %v3347_v55 }
 0x2ed   : > { %2308 = vmatpush1.bf16.msra.mxu0 %v3342_v52  ;;  %2351 = vmatpush1.bf16.msra.mxu1 %v3345_v54 }
 0x2ee   : > { %2309 = vmatprep.subr.bf16.mxu0 %v3350_v56  ;;  %2352 = vmatprep.subr.bf16.mxu1 %v3353_v59 }
 0x2f1   : > { %2310 = vmatpush1.bf16.msra.mxu0 %v3348_v60  ;;  %2353 = vmatpush1.bf16.msra.mxu1 %v3351_v61 }
 0x2f2   : > { %2311 = vmatprep.subr.bf16.mxu0 %v3356_v0  ;;  %2354 = vmatprep.subr.bf16.mxu1 %v3359_v2  ;;  %v2077_v0 = vpop.permute.xlu0 %2076 }
 0x2f3   : > { %vm2081_vm12 = vcmp.eq.s32.totalorder %v2077_v0, 1 }
 0x2f5   : > { %2312 = vmatpush1.bf16.msra.mxu0 %v3354_v3  ;;  %2355 = vmatpush1.bf16.msra.mxu1 %v3357_v4 }
 0x2f6   : > { %2313 = vmatprep.subr.bf16.mxu0 %v3362_v5  ;;  %2356 = vmatprep.subr.bf16.mxu1 %v3365_v9 }
 0x2f9   : > { %2314 = vmatpush1.bf16.msra.mxu0 %v3360_v10  ;;  %2357 = vmatpush1.bf16.msra.mxu1 %v3363_v12  ;;  %v2080_v12 = vpop.permute.xlu1 %2079 }
 0x2fa   : > { %2315 = vmatprep.subr.bf16.mxu0 %v3368_v13  ;;  %2358 = vmatprep.subr.bf16.mxu1 %v3371_v14  ;;  %vm2082_vm13 = vcmp.eq.s32.totalorder %v2080_v12, 1 }
 0x2fd   : > { %2316 = vmatpush1.bf16.msra.mxu0 %v3366_v16  ;;  %2359 = vmatpush1.bf16.msra.mxu1 %v3369_v17 }
 0x39f   : > { %v1961_v18 = vpop.f32.mrf.mxu0  ;;  %v2004_v29 = vpop.f32.mrf.mxu1 }
 0x3a0   : > { %v2013_v21 = vadd.f32 %v1961_v18, %v4726_v11  ;;  %v2015_v19 = vadd.f32 %v2004_v29, %v4730_v1  ;;  %v4737_v1 = vld [vmem:[#allocation56_spill] sm:$0xff] }
 0x3a1   : > { %v1963_v25 = vpop.f32.mrf.mxu0  ;;  %v2006_v58 = vpop.f32.mrf.mxu1 }
 0x3a2   : > { %v2958_v33 = vmul.f32 -1.442695, %v2013_v21  ;;  %v2014_v63 = vadd.f32 %v1963_v25, %v4727_v38  ;;  %v2960_v62 = vmul.f32 -1.442695, %v2015_v19  ;;  %v2016_v8 = vadd.f32 %v2006_v58, %v4732_v15  ;;  %v4734_v38 = vld [vmem:[#allocation50_spill] sm:$0xff]  ;;  %v4739_v15 = vld [vmem:[#allocation55_spill] sm:$0xff] }
 0x3a3   : > { %v1965_v31 = vpop.f32.mrf.mxu0  ;;  %v2008_v26 = vpop.f32.mrf.mxu1 }
 0x3a4   : > { %3436 = vpow2.f32 %v2958_v33  ;;  %v2959_v20 = vmul.f32 -1.442695, %v2014_v63  ;;  %v2017_v6 = vadd.f32 %v1965_v31, %v4728_v36  ;;  %v2019_v32 = vadd.f32 %v2008_v26, %v4731_v37  ;;  %v4738_v37 = vld [vmem:[#allocation51_spill] sm:$0xff] }
 0x3a5   : > { %v1967_v48 = vpop.f32.mrf.mxu0  ;;  %v2010_v40 = vpop.f32.mrf.mxu1 }
 0x3a6   : > { %3438 = vpow2.f32 %v2959_v20  ;;  %v2961_v7 = vmul.f32 -1.442695, %v2017_v6  ;;  %v2018_v39 = vadd.f32 %v1967_v48, %v4729_v22  ;;  %v2963_v30 = vmul.f32 -1.442695, %v2019_v32  ;;  %v4735_v6 = vld [vmem:[#allocation52_spill] sm:$0xff] }
 0x3a7   : > { %v2020_v28 = vadd.f32 %v2010_v40, %v4733_v45 }
 0x3a8   : > { %3440 = vpow2.f32 %v2961_v7  ;;  %v2962_v27 = vmul.f32 -1.442695, %v2018_v39 }
 0x3aa   : > { %3442 = vpow2.f32 %v2962_v27 }
 0x3ab   : > { %3444 = vpow2.f32 %v2960_v62 }
 0x3ac   : > { %3446 = vtanh.f32 %v2016_v8 }
 0x3b1   : > { %v3437_v42 = vpop.eup %3436 }
 0x3b2   : > { %v2039_v43 = vadd.f32 1.0, %v3437_v42  ;;  %v4740_v42 = vld [vmem:[#allocation53_spill] sm:$0xff] }
 0x3b3   : > { %v3439_v44 = vpop.eup %3438 }
 0x3b4   : > { %3448 = vrcp.f32 %v2039_v43  ;;  %v2040_v57 = vadd.f32 1.0, %v3439_v44 }
 0x3b5   : > { %v3441_v46 = vpop.eup %3440  ;;  %3450 = vpow2.f32 %v2963_v30 }
 0x3b6   : > { %3452 = vrcp.f32 %v2040_v57  ;;  %v2042_v47 = vadd.f32 1.0, %v3441_v46  ;;  %v4741_v46 = vld [vmem:[#allocation57_spill] sm:$0xff] }
 0x3b7   : > { %v3443_v49 = vpop.eup %3442  ;;  %3454 = vtanh.f32 %v2020_v28 }
 0x3b8   : > { %3456 = vrcp.f32 %v2042_v47  ;;  %v2043_v50 = vadd.f32 1.0, %v3443_v49  ;;  %v3445_v51 = vpop.eup %3444 }
 0x3b9   : > { %v3447_v34 = vpop.eup %3446  ;;  %v2041_v56 = vadd.f32 1.0, %v3445_v51 }
 0x3ba   : > { %3458 = vrcp.f32 %v2043_v50 }
 0x3bb   : > { %3460 = vrcp.f32 %v2041_v56 }
 0x3c1   : > { %v3449_v52 = vpop.eup %3448 }
 0x3c2   : > { %v3451_v53 = vpop.eup %3450  ;;  %v2061_v54 = vmul.f32 %v3449_v52, %v3447_v34 }
 0x3c3   : > { %v3453_v55 = vpop.eup %3452  ;;  %v2044_v5 = vadd.f32 1.0, %v3451_v53 }
 0x3c4   : > { %v3455_v59 = vpop.eup %3454  ;;  %v2059_v60 = vmul.f32 %v3453_v55, %v4426_v23 }
 0x3c5   : > { %v3457_v61 = vpop.eup %3456 }
 0x3c6   : > { %v2063_v2 = vadd.f32 %v2061_v54, %v2059_v60  ;;  %v2062_v3 = vmul.f32 %v3457_v61, %v3455_v59 }
 0x3c7   : > { %v3459_v4 = vpop.eup %3458 }
 0x3c8   : > { %3462 = vtanh.f32 %v2063_v2  ;;  %v2060_v9 = vmul.f32 %v3459_v4, %v4430_v24  ;;  %v4456_v10 = vsel %vm2081_vm12, %v2063_v2, %v4426_v23  ;;  %v3461_v16 = vpop.eup %3460  ;;  %v2451_v2 = vpop.permute.xlu0 %2450 }
 0x3c9   : > { %3464 = vrcp.f32 %v2044_v5  ;;  %vm2455_vm14 = vcmp.eq.s32.totalorder %v2451_v2, 1 }
 0x3ca   : > { %v2064_v13 = vadd.f32 %v2062_v3, %v2060_v9 }
 0x3cc   : > { %3466 = vtanh.f32 %v2064_v13  ;;  %v4459_v14 = vsel %vm2082_vm13, %v2064_v13, %v4430_v24 }
 0x3d5   : > { %v3463_v17 = vpop.eup %3462 }
 0x3d6   : > { %v2067_v18 = vmul.f32 %v3463_v17, %v3461_v16  ;;  %v3465_v11 = vpop.eup %3464  ;;  %v2454_v16 = vpop.permute.xlu1 %2453 }
 0x3d7   : > { %vm2456_vm15 = vcmp.eq.s32.totalorder %v2454_v16, 1 }
 0x3d8   : > { %v4463_v23 = vsel %vm2081_vm12, %v2067_v18, %v4434_v35 }
 0x3d9   : > { %v3467_v21 = vpop.eup %3466 }
 0x3da   : > { %v2068_v25 = vmul.f32 %v3467_v21, %v3465_v11 }
 0x3dc   : > { %v4466_v33 = vsel %vm2082_vm13, %v2068_v25, %v4437_v41  ;;  %v4736_v41 = vld [vmem:[#allocation54_spill] sm:$0xff] }
 0x3dd   : > { %v2087_v29 = vpack.c.bf16 %v4466_v33, %v4463_v23 }
 0x3df   : > { %3057 = vst [vmem:[%s4067_s8 + $0x10] sm:$0xff] %v2087_v29   ;;  %2334 = vmatmul.mubr.bf16.vlgmr.msra.gmra.mxu0 %v2087_v29  ;;  %2377 = vmatmul.mubr.bf16.vlgmr.msra.gmra.mxu1 %v2087_v29 }
 0x49f   : > { %v2335_v24 = vpop.f32.mrf.mxu0  ;;  %v2378_v36 = vpop.f32.mrf.mxu1 }
 0x4a0   : > { %v2387_v63 = vadd.f32 %v2335_v24, %v4734_v38  ;;  %v2389_v32 = vadd.f32 %v2378_v36, %v4738_v37 }
 0x4a1   : > { %v2337_v31 = vpop.f32.mrf.mxu0  ;;  %v2380_v39 = vpop.f32.mrf.mxu1 }
 0x4a2   : > { %v3000_v20 = vmul.f32 -1.442695, %v2387_v63  ;;  %v2388_v48 = vadd.f32 %v2337_v31, %v4735_v6  ;;  %v3002_v40 = vmul.f32 -1.442695, %v2389_v32  ;;  %v2390_v30 = vadd.f32 %v2380_v39, %v4740_v42 }
 0x4a3   : > { %v2339_v35 = vpop.f32.mrf.mxu0  ;;  %v2382_v62 = vpop.f32.mrf.mxu1 }
 0x4a4   : > { %3468 = vpow2.f32 %v3000_v20  ;;  %v3001_v58 = vmul.f32 -1.442695, %v2388_v48  ;;  %v2391_v7 = vadd.f32 %v2339_v35, %v4736_v41  ;;  %v2393_v8 = vadd.f32 %v2382_v62, %v4739_v15 }
 0x4a5   : > { %v2341_v22 = vpop.f32.mrf.mxu0  ;;  %v2384_v43 = vpop.f32.mrf.mxu1 }
 0x4a6   : > { %3470 = vpow2.f32 %v3001_v58  ;;  %v3003_v27 = vmul.f32 -1.442695, %v2391_v7  ;;  %v2392_v19 = vadd.f32 %v2341_v22, %v4737_v1  ;;  %v3005_v45 = vmul.f32 -1.442695, %v2393_v8 }
 0x4a7   : > { %v2394_v47 = vadd.f32 %v2384_v43, %v4741_v46 }
 0x4a8   : > { %3472 = vpow2.f32 %v3003_v27  ;;  %v3004_v26 = vmul.f32 -1.442695, %v2392_v19 }
 0x4aa   : > { %3474 = vpow2.f32 %v3004_v26 }
 0x4ab   : > { %3476 = vpow2.f32 %v3002_v40 }
 0x4ac   : > { %3478 = vtanh.f32 %v2390_v30 }
 0x4b1   : > { %v3469_v44 = vpop.eup %3468 }
 0x4b2   : > { %v2413_v28 = vadd.f32 1.0, %v3469_v44 }
 0x4b3   : > { %v3471_v57 = vpop.eup %3470 }
 0x4b4   : > { %3480 = vrcp.f32 %v2413_v28  ;;  %v2414_v49 = vadd.f32 1.0, %v3471_v57 }
 0x4b5   : > { %v3473_v50 = vpop.eup %3472  ;;  %3482 = vpow2.f32 %v3005_v45 }
 0x4b6   : > { %3484 = vrcp.f32 %v2414_v49  ;;  %v2416_v51 = vadd.f32 1.0, %v3473_v50 }
 0x4b7   : > { %v3475_v34 = vpop.eup %3474  ;;  %3486 = vtanh.f32 %v2394_v47 }
 0x4b8   : > { %3488 = vrcp.f32 %v2416_v51  ;;  %v2417_v52 = vadd.f32 1.0, %v3475_v34  ;;  %v3477_v53 = vpop.eup %3476 }
 0x4b9   : > { %v3479_v54 = vpop.eup %3478  ;;  %v2415_v61 = vadd.f32 1.0, %v3477_v53 }
 0x4ba   : > { %3490 = vrcp.f32 %v2417_v52 }
 0x4bb   : > { %3492 = vrcp.f32 %v2415_v61 }
 0x4c1   : > { %v3481_v55 = vpop.eup %3480 }
 0x4c2   : > { %v3483_v56 = vpop.eup %3482  ;;  %v2435_v59 = vmul.f32 %v3481_v55, %v3479_v54 }
 0x4c3   : > { %v3485_v60 = vpop.eup %3484  ;;  %v2418_v13 = vadd.f32 1.0, %v3483_v56 }
 0x4c4   : > { %v3487_v0 = vpop.eup %3486  ;;  %v2433_v3 = vmul.f32 %v3485_v60, %v4456_v10 }
 0x4c5   : > { %v3489_v4 = vpop.eup %3488 }
 0x4c6   : > { %v2437_v5 = vadd.f32 %v2435_v59, %v2433_v3  ;;  %v2436_v9 = vmul.f32 %v3489_v4, %v3487_v0 }
 0x4c7   : > { %v3491_v12 = vpop.eup %3490 }
 0x4c8   : > { %3494 = vtanh.f32 %v2437_v5  ;;  %v2459_v17 = vsel %vm2455_vm14, %v2437_v5, %v4456_v10  ;;  %v2434_v18 = vmul.f32 %v3491_v12, %v4459_v14  ;;  %v3493_v25 = vpop.eup %3492 }
 0x4c9   : > { %2474 = vst [vmem:[%s4071_s6] sm:$0xff] %v2459_v17  ;;  %3496 = vrcp.f32 %v2418_v13 }
 0x4ca   : > { %v2438_v11 = vadd.f32 %v2436_v9, %v2434_v18 }
 0x4cc   : > { %3498 = vtanh.f32 %v2438_v11  ;;  %v2460_v21 = vsel %vm2456_vm15, %v2438_v11, %v4459_v14 }
 0x4cd   : > { %2475 = vst [vmem:[%s4071_s6 + $0x8] sm:$0xff] %v2460_v21 }
 0x4d5   : > { %v3495_v29 = vpop.eup %3494 }
 0x4d6   : > { %v2441_v24 = vmul.f32 %v3495_v29, %v3493_v25  ;;  %v3497_v38 = vpop.eup %3496 }
 0x4d8   : > { %v2457_v10 = vsel %vm2455_vm14, %v2441_v24, %v4463_v23 }
 0x4d9   : > { %v3499_v63 = vpop.eup %3498  ;;  %2472 = vst [vmem:[%s4069_s7] sm:$0xff] %v2457_v10 }
 0x4da   : > { %v2442_v31 = vmul.f32 %v3499_v63, %v3497_v38 }
 0x4dc   : > { %v2458_v20 = vsel %vm2456_vm15, %v2442_v31, %v4466_v33 }
 0x4dd   : > { %v3054_v36 = vpack.c.bf16 %v2458_v20, %v2457_v10  ;;  %2473 = vst [vmem:[%s4069_s7 + $0x8] sm:$0xff] %v2458_v20 }
 0x4df   : > { %3058 = vst [vmem:[%s4067_s8 + $0x18] sm:$0xff] %v3054_v36  }
 0x4e0   : > { %s4742_s24 = sld [smem:[#allocation34_spill]]  ;;  %s3033_s30 = sshll.u32 %s4699_s3, 4 }
 0x4e1   : > { %s2513_s29 = sshll.u32 %s4067_s8, 4  ;;  %s2500_s17 = sadd.s32 %s3033_s30, %s4055_s28  ;;  %s2514_s29 = int_to_ptr.vmem [resolvable:$true] %s2513_s29 }
 0x4e2   : > { %s3016_s26 = sshll.u32 %s2500_s17, 6  ;;  %s4743_s20 = sld [smem:[#allocation62_spill]] }
 0x4e3   : > { %s3752_s22 = smov 128   ;;  %s3753_s9 = smov 256  }
 0x4e4   : > { %s3754_s25 = smov 2   ;;  %s3755_s3 = smov 64  }
 0x4e5   : > { %s3756_s28 = smov 4   ;;  %s3757_s8 = smov 131072  }
 0x4e6   : > { %p4744_p10 = scmp.ne.s32.totalorder %s4742_s24, 0  ;;  %s3758_s23 = smov 0  }
 0x4e7   : > { %s3034_s14 = sshll.u32 %s3724_s16, 8  ;;  %s2542_s1 = sshll.u32 %s4069_s7, 4  ;;  %s4527_s1 = int_to_ptr.vmem [resolvable:$true] %s2542_s1 }
 0x4e8   : > { %s2502_s27 = scalar_lea.hbm %s4743_s20, %s3016_s26  ;;  %3078 = sst [smem:[#allocation18]] (%p4744_p10), %s3752_s22 }
 0x4e9   : > { %3079 = sst [smem:[#allocation18 + $0x1]] (%p4744_p10), %s3753_s9  ;;  %s3578_s19 = scalar_lea.vmem %s4527_s1, 256 }
 0x4ea   : > { %3080 = sst [smem:[#allocation18 + $0x2]] (%p4744_p10), %s3754_s25  ;;  %p3579_p1 = scmp.ne.s32.totalorder %s4527_s1, %s3578_s19 }
 0x4eb   : > { %3081 = sst [smem:[#allocation18 + $0x3]] (%p4744_p10), %s3755_s3 }
 0x4ec   : > { %3082 = sst [smem:[#allocation18 + $0x4]] (%p4744_p10), %s3755_s3 }
 0x4ed   : > { %3083 = sst [smem:[#allocation18 + $0x5]] (%p4744_p10), %s3756_s28 }
 0x4ee   : > { %3084 = dma.general (%p4744_p10), %s2514_s29, 512, %s2502_s27, %s2477_s12, %s3757_s8, [#allocation18], %s3758_s23, 0  }
 0x4ef   : > { %s4745_s2 = sld [smem:[#allocation35_spill]]  ;;  %s3759_s12 = smov [#allocation12]  }
 0x4f0   : > { %s4746_s26 = sld [smem:[#allocation63_spill]]  ;;  %s3582_s24 = sshll.u32 %s3759_s12, 4  ;;  %s3583_s24 = int_to_ptr.vmem [resolvable:$false] %s3582_s24 }
 0x4f1   : > { %s3584_s7 = scalar_lea.vmem %s3583_s24, 512  ;;  %p3585_p4 = scmp.lt.s32.totalorder %s4527_s1, %s3583_s24 }
 0x4f2   : > { %p3586_p8 = scmp.lt.s32.totalorder %s3584_s7, %s3578_s19 }
 0x4f4   : > { %p3587_p0 = por %p3586_p8, %p3585_p4 }
 0x4f5   : > { %p4747_p11 = scmp.ne.s32.totalorder %s4745_s2, 0 }
 0x4f6   : > { %s4525_s15 = scalar_lea.hbm %s4746_s26, %s3034_s14 }
 0x4f7   : > { %p3580_p3 = pnand %p3579_p1, %p4747_p11 }
 0x4f9   : > { %p3581_p5 = pneg %p3580_p3 }
 0x4fb   : > { %p3588_p7 = pnand %p3587_p0, %p3581_p5 }
 0x4fd   : > { %3591 = shalt.err (!%p3588_p7)
}
 0x4fe   : > { %s3592_s29 = scalar_lea.hbm %s4525_s15, 256  ;;  %s3596_s22 = scalar_lea.hbm %s4746_s26, 512 }
 0x4ff   : > { %p3593_p12 = scmp.ne.s32.totalorder %s4525_s15, %s3592_s29  ;;  %p3597_p13 = scmp.lt.s32.totalorder %s4525_s15, %s4746_s26 }
 0x500   : > { %p3598_p2 = scmp.lt.s32.totalorder %s3596_s22, %s3592_s29 }
 0x501   : > { %p3594_p9 = pnand %p3593_p12, %p4747_p11 }
 0x502   : > { %p3599_p10 = por %p3598_p2, %p3597_p13 }
 0x503   : > { %p3595_p6 = pneg %p3594_p9 }
 0x505   : > { %p3600_p1 = pnand %p3599_p10, %p3595_p6 }
 0x507   : > { %3603 = shalt.err (!%p3600_p1)
}
 0x508   : > { %s3760_s3 = smov 128   ;;  %s3761_s28 = smov 8  }
 0x509   : > { %3085 = dma.vmem_to_hbm [thread:$0]  (%p4747_p11), %s4527_s1, 256, %s4525_s15, %s4496_s21, %s3760_s3, %s3760_s3, %s3761_s28  }
 0x50a   : > { %s4748_s30 = sld [smem:[#allocation64_spill]]  ;;  %s2558_s19 = sshll.u32 %s4071_s6, 4  ;;  %s2559_s19 = int_to_ptr.vmem [resolvable:$true] %s2558_s19 }
 0x50b   : > { %s3604_s12 = scalar_lea.vmem %s2559_s19, 256  ;;  %s3762_s7 = smov [#allocation14]  }
 0x50c   : > { %p3605_p3 = scmp.ne.s32.totalorder %s2559_s19, %s3604_s12  ;;  %s3608_s29 = sshll.u32 %s3762_s7, 4  ;;  %s3609_s29 = int_to_ptr.vmem [resolvable:$false] %s3608_s29 }
 0x50d   : > { %s3610_s20 = scalar_lea.vmem %s3609_s29, 512  ;;  %p3611_p8 = scmp.lt.s32.totalorder %s2559_s19, %s3609_s29 }
 0x50e   : > { %p3606_p5 = pnand %p3605_p3, %p4747_p11  ;;  %p3612_p0 = scmp.lt.s32.totalorder %s3610_s20, %s3604_s12 }
 0x510   : > { %s4749_s24 = smov %s4748_s30  ;;  %s4558_s17 = scalar_lea.hbm %s4748_s30, %s3034_s14 }
 0x511   : > { %p3607_p4 = pneg %p3606_p5  ;;  %p3613_p7 = por %p3612_p0, %p3611_p8 }
 0x513   : > { %p3614_p12 = pnand %p3613_p7, %p3607_p4 }
 0x515   : > { %3617 = shalt.err (!%p3614_p12)
}
 0x516   : > { %s3618_s16 = scalar_lea.hbm %s4558_s17, 256  ;;  %s3622_s1 = scalar_lea.hbm %s4749_s24, 512 }
 0x517   : > { %p3619_p9 = scmp.ne.s32.totalorder %s4558_s17, %s3618_s16  ;;  %p3623_p2 = scmp.lt.s32.totalorder %s4558_s17, %s4749_s24 }
 0x518   : > { %p3624_p10 = scmp.lt.s32.totalorder %s3622_s1, %s3618_s16 }
 0x519   : > { %p3620_p6 = pnand %p3619_p9, %p4747_p11 }
 0x51a   : > { %p3625_p1 = por %p3624_p10, %p3623_p2 }
 0x51b   : > { %p3621_p13 = pneg %p3620_p6 }
 0x51d   : > { %p3626_p3 = pnand %p3625_p1, %p3621_p13 }
 0x51f   : > { %3629 = shalt.err (!%p3626_p3)
}
 0x520   : > { %3086 = dma.vmem_to_hbm [thread:$0]  (%p4747_p11), %s2559_s19, 256, %s4558_s17, %s4496_s21, %s3760_s3, %s3760_s3, %s3761_s28  }
 0x521 PF: > { %s4750_s22 = sld [smem:[#allocation29_spill]] }
 0x522   : > { %s4751_s9 = sld [smem:[#allocation25_spill]] }
 0x523   : > { %s4752_s25 = sld [smem:[#allocation36_spill]] }
 0x527   : > { %p3111_p5 = scmp.ge.s32.totalorder %s4750_s22, 2 }
 0x528   : > { %s2573_s8 = sand.u32 1, %s4751_s9  }
 0x529   : > { %p4753_p4 = scmp.ne.s32.totalorder %s4752_s25, 0  ;;  %s2574_s23 = scalar_lea.sflag [#allocation5], %s2573_s8 }
 0x52b   : > { %p3098_p8 = pnand %p3111_p5, %p4753_p4 }
 0x52d   : > { %p3099_p0 = pneg %p3098_p8 }
 0x52f   : > { %3687 = dma.done.wait (%p3099_p0), %s2574_s23, 512  }
 0x530   : > { %3689 = vsyncadd (%p3099_p0), %s2574_s23, 4294966784  ;;  %s4754_s2 = sadd.s32 4294967294, %s4750_s22   ;;  %s4755_s30 = sld [smem:[#allocation37_spill]] }
 0x531   : > { %s2582_s12 = sand.u32 1, %s4754_s2  }
 0x532   : > { %s2583_s21 = scalar_lea.sflag [#allocation13], %s2582_s12 }
 0x536   : > { %p4756_p7 = scmp.ne.s32.totalorder %s4755_s30, 0 }
 0x538   : > { %p3101_p12 = pnand %p3111_p5, %p4756_p7 }
 0x53a   : > { %p3102_p9 = pneg %p3101_p12 }
 0x53c   : > { %3691 = dma.done.wait (%p3102_p9), %s2583_s21, 512  }
 0x53d   : > { %3693 = vsyncadd (%p3102_p9), %s2583_s21, 4294966784  ;;  %s33_s19 = sadd.s32 1, %s4750_s22   ;;  %s4757_s3 = sld [smem:[#allocation32_spill]] }
 0x53e   : > { %p30_p11 = scmp.ge.s32.totalorder %s33_s19, 6   ;;  %s4758_s28 = sld [smem:[#allocation26_spill]] }
 0x53f   : > { %s4759_s14 = sld [smem:[#allocation33_spill]]  ;;  %s4763_s30 = smov %s3700_s10 }
 0x540   : > { %s4760_s15 = sld [smem:[#allocation28_spill]]  ;;  %s4764_s10 = smov %s3704_s11 }
 0x541   : > { %s4761_s17 = sld [smem:[#allocation30_spill]]  ;;  %s4766_s12 = smov %s3712_s13 }
 0x542   : > { %s4762_s7 = sld [smem:[#allocation31_spill]]  ;;  %s4768_s16 = smov %s3732_s18 }
 0x543   : > { %s4765_s11 = smov %s4757_s3 }
 0x544   : > { %s4767_s13 = smov %s4758_s28  ;;  %32 = sbr.rel (!%p30_p11) target bundleno = 22 (0x16), region = 173 }
 0x548   : > { %s4769_s18 = smov %s4762_s7 }
 0x549   :  { %2597 = vsyncpa [#allocation4], 1 }
 0x54a   :  { %2599 = vsyncpa [#allocation4 + $0x1], 1 }
 0x54b   :  { %2600 = vsyncpa [#allocation7], 1 }
 0x54c   :  { %2601 = vsyncpa [#allocation10], 1 }
 0x54d   :  { %2603 = vsyncpa [#allocation10 + $0x1], 1 }
 0x54e   :  { %2604 = vsyncpa [#allocation5], 1 }
 0x54f   :  { %2606 = vsyncpa [#allocation5 + $0x1], 1 }
 0x550   :  { %2607 = vsyncpa [#allocation13], 1 }
 0x551   :  { %2609 = vsyncpa [#allocation13 + $0x1], 1 }

</bundles_post_ra>
